<compile_context>
chip_gen: v6e
topology: v6e:2x2x1
jax: 0.10.0
libtpu: 0.0.40
codegen_flags: <defaults>
</compile_context>

<pallas_src>
import math
import functools

import jax
import jax.numpy as jnp
from jax.experimental import pallas as pl
from jax.experimental.pallas import tpu as pltpu


# --------------------------------------------------------------------------
# Helpers
# --------------------------------------------------------------------------
def _layer_norm(x, g, b, eps):
    """nn.LayerNorm convention: (x - mean) * rsqrt(biased_var + eps) * g + b."""
    mean = jnp.mean(x, axis=-1, keepdims=True)
    var = jnp.mean(jnp.square(x - mean), axis=-1, keepdims=True)
    return (x - mean) * jax.lax.rsqrt(var + eps) * g + b


# --------------------------------------------------------------------------
# Fused encoder kernel: grid = (batch_tiles, n_layers)
# --------------------------------------------------------------------------
def _encoder_kernel(x_ref,
                    ln1g_ref, ln1b_ref, wqkv_ref, bqkv_ref, wo_ref, bo_ref,
                    ln2g_ref, ln2b_ref, w1_ref, b1_ref, w2_ref, b2_ref,
                    ng_ref, nb_ref,
                    o_ref, p_ref,
                    x_scr,
                    *, bt, n_heads, eps, scale, compute_dtype):
    l = pl.program_id(1)
    n_layers = pl.num_programs(1)

    S = x_ref.shape[1]
    D = x_ref.shape[2]
    H = n_heads
    Dh = D // H
    cdt = compute_dtype

    def mm(a, b):                       # [m,k] @ [k,n] -> [m,n], f32 accum
        return jnp.dot(a.astype(cdt), b.astype(cdt),
                       preferred_element_type=jnp.float32)

    def mm_nt(a, b):                    # [m,k] @ [n,k]^T -> [m,n], f32 accum
        return jax.lax.dot_general(
            a.astype(cdt), b.astype(cdt),
            dimension_numbers=(((1,), (1,)), ((), ())),
            preferred_element_type=jnp.float32)

    # ---- at layer 0: load the batch-folded residual into the VMEM scratch ----
    @pl.when(l == 0)
    def _():
        for bb in range(bt):
            x_scr[bb * S:(bb + 1) * S, :] = x_ref[bb].astype(jnp.float32)

    x = x_scr[...]                                        # [bt*S, D] f32

    # ---- sublayer 1: pre-norm multi-head self-attention + residual ----
    xn = _layer_norm(x, ln1g_ref[0], ln1b_ref[0], eps)    # [bt*S, D]

    # Per-head projections via STATIC ref slices of the fused QKV weight
    # (no value-level lane slicing, no head concat).
    q_heads, k_heads, v_heads = [], [], []
    for h in range(H):
        qs = slice(h * Dh, (h + 1) * Dh)
        ks = slice(D + h * Dh, D + (h + 1) * Dh)
        vs = slice(2 * D + h * Dh, 2 * D + (h + 1) * Dh)
        q_heads.append(mm(xn, wqkv_ref[0, :, qs]) + bqkv_ref[0, :, qs])
        k_heads.append(mm(xn, wqkv_ref[0, :, ks]) + bqkv_ref[0, :, ks])
        v_heads.append(mm(xn, wqkv_ref[0, :, vs]) + bqkv_ref[0, :, vs])

    probs = []                                            # last-layer writeback
    for bb in range(bt):
        rs = slice(bb * S, (bb + 1) * S)
        acc = jnp.zeros((S, D), jnp.float32)
        for h in range(H):
            s = mm_nt(q_heads[h][rs], k_heads[h][rs]) * scale       # [S, S]
            m = jnp.max(s, axis=-1, keepdims=True)
            e = jnp.exp(s - m)
            p = e / jnp.sum(e, axis=-1, keepdims=True)              # exact softmax
            probs.append((bb, h, p))
            # fold head output straight into the output projection
            acc = acc + mm(mm(p, v_heads[h][rs]),
                           wo_ref[0, h * Dh:(h + 1) * Dh, :])       # [S, D]
        x_scr[rs, :] = x[rs] + acc + bo_ref[0]

    x = x_scr[...]

    # ---- sublayer 2: pre-norm position-wise FFN (ReLU) + residual ----
    xn2 = _layer_norm(x, ln2g_ref[0], ln2b_ref[0], eps)
    h1 = jnp.maximum(mm(xn2, w1_ref[0]) + b1_ref[0], 0.0)           # [bt*S, DFF]
    x = x + mm(h1, w2_ref[0]) + b2_ref[0]
    x_scr[...] = x

    # ---- last layer only: final LayerNorm + attention-prob writeback ----
    @pl.when(l == n_layers - 1)
    def _():
        y = _layer_norm(x, ng_ref[...], nb_ref[...], eps)
        for bb in range(bt):
            o_ref[bb] = y[bb * S:(bb + 1) * S, :].astype(o_ref.dtype)
        for bb, h, p in probs:
            p_ref[bb, h, :, :] = p.astype(p_ref.dtype)


# --------------------------------------------------------------------------
# Wrapper
# --------------------------------------------------------------------------
def _derive_vmem_limit_bytes(params, bt, S, D, H):
    """Size the scoped VMEM limit from actual resident bytes (review item 8)."""
    per_layer_keys = ("ln1_g", "ln1_b", "wqkv", "bqkv", "wo", "bo",
                      "ln2_g", "ln2_b", "w1", "b1", "w2", "b2")
    per_layer = sum(math.prod(params[k].shape[1:]) * params[k].dtype.itemsize
                    for k in per_layer_keys)
    io = 2 * (bt * S * D * 4) + 2 * (bt * H * S * S * 4)   # x in + both outputs
    scratch = bt * S * D * 4
    est = 3 * per_layer + 2 * io + scratch + (8 << 20)     # 2-deep weight bufs + margin
    return int(min(max(est, 16 << 20), 64 << 20))          # stay under v7x's 64 MiB


def encoder_forward(params, x, c, *, batch_tile=None):
    """x: [B, S, D]; c: scalar threaded through layers (unused by this layer)."""
    del c  # TODO(synk): scalar `c` is consumed by the injected layer; unused here.
    B, S, D = x.shape
    H = int(params["n_heads"])
    N = params["wqkv"].shape[0]
    eps = 1e-5
    scale = 1.0 / math.sqrt(D // H)

    # Fold enough bags into one grid step that the matmul M dim feeds the MXU.
    if batch_tile is None:
        batch_tile = min(B, max(1, 128 // S))
    assert B % batch_tile == 0, "batch must be divisible by batch_tile"
    nb = B // batch_tile

    def layer_spec(arr):
        nz = arr.ndim - 1
        return pl.BlockSpec((1,) + arr.shape[1:], lambda b, l: (l,) + (0,) * nz)

    def whole_spec(arr):
        nd = arr.ndim
        return pl.BlockSpec(arr.shape, lambda b, l: (0,) * nd)

    kernel = functools.partial(
        _encoder_kernel, bt=batch_tile, n_heads=H, eps=eps, scale=scale,
        compute_dtype=jnp.bfloat16)

    out, probs = pl.pallas_call(
        kernel,
        grid=(nb, N),
        out_shape=(
            jax.ShapeDtypeStruct((B, S, D), x.dtype),
            jax.ShapeDtypeStruct((B, H, S, S), jnp.float32),
        ),
        in_specs=[
            pl.BlockSpec((batch_tile, S, D), lambda b, l: (b, 0, 0)),
            layer_spec(params["ln1_g"]), layer_spec(params["ln1_b"]),
            layer_spec(params["wqkv"]), layer_spec(params["bqkv"]),
            layer_spec(params["wo"]), layer_spec(params["bo"]),
            layer_spec(params["ln2_g"]), layer_spec(params["ln2_b"]),
            layer_spec(params["w1"]), layer_spec(params["b1"]),
            layer_spec(params["w2"]), layer_spec(params["b2"]),
            whole_spec(params["norm_g"]), whole_spec(params["norm_b"]),
        ],
        out_specs=(
            pl.BlockSpec((batch_tile, S, D), lambda b, l: (b, 0, 0)),
            pl.BlockSpec((batch_tile, H, S, S), lambda b, l: (b, 0, 0, 0)),
        ),
        scratch_shapes=[pltpu.VMEM((batch_tile * S, D), jnp.float32)],
        compiler_params=pltpu.CompilerParams(
            dimension_semantics=("parallel", "arbitrary"),
            vmem_limit_bytes=_derive_vmem_limit_bytes(params, batch_tile, S, D, H),
        ),
    )(x,
      params["ln1_g"], params["ln1_b"],
      params["wqkv"], params["bqkv"],
      params["wo"], params["bo"],
      params["ln2_g"], params["ln2_b"],
      params["w1"], params["b1"],
      params["w2"], params["b2"],
      params["norm_g"], params["norm_b"])
    return out, probs


# --------------------------------------------------------------------------
# Parameters (per-layer weights stacked along a leading layer axis)
# --------------------------------------------------------------------------
def init_encoder_params(key, n_layers, d_model, n_heads, d_ff,
                        param_dtype=jnp.bfloat16):
    def lin(k, fi, fo):
        kw, kb = jax.random.split(k)
        w = jax.random.normal(kw, (fi, fo), jnp.float32) * 0.02
        b = jax.random.normal(kb, (fo,), jnp.float32) * 0.02
        return w, b

    wqkv, bqkv, wo, bo, w1, b1, w2, b2 = ([] for _ in range(8))
    keys = jax.random.split(key, n_layers)
    for lk in keys:
        ks = jax.random.split(lk, 6)
        wq, bq_ = lin(ks[0], d_model, d_model)
        wk, bk_ = lin(ks[1], d_model, d_model)
        wv, bv_ = lin(ks[2], d_model, d_model)
        wo_l, bo_l = lin(ks[3], d_model, d_model)
        w1_l, b1_l = lin(ks[4], d_model, d_ff)
        w2_l, b2_l = lin(ks[5], d_ff, d_model)
        wqkv.append(jnp.concatenate([wq, wk, wv], axis=1))       # [D, 3D]
        bqkv.append(jnp.concatenate([bq_, bk_, bv_])[None, :])   # [1, 3D]
        wo.append(wo_l); bo.append(bo_l[None, :])
        w1.append(w1_l); b1.append(b1_l[None, :])
        w2.append(w2_l); b2.append(b2_l[None, :])

    stack_w = lambda xs: jnp.stack(xs, 0).astype(param_dtype)    # bf16 weights
    stack_b = lambda xs: jnp.stack(xs, 0)                        # f32 biases
    N = n_layers
    return dict(
        n_heads=n_heads,
        ln1_g=jnp.ones((N, 1, d_model), jnp.float32),
        ln1_b=jnp.zeros((N, 1, d_model), jnp.float32),
        ln2_g=jnp.ones((N, 1, d_model), jnp.float32),
        ln2_b=jnp.zeros((N, 1, d_model), jnp.float32),
        wqkv=stack_w(wqkv), bqkv=stack_b(bqkv),
        wo=stack_w(wo), bo=stack_b(bo),
        w1=stack_w(w1), b1=stack_b(b1),
        w2=stack_w(w2), b2=stack_b(b2),
        norm_g=jnp.ones((1, d_model), jnp.float32),
        norm_b=jnp.zeros((1, d_model), jnp.float32),
    )


# --------------------------------------------------------------------------
if __name__ == "__main__":
    B, S, D = 2, 8, 32          # batch (bags), sequence (patches), d_model
    H, DFF, N_LAYERS = 4, 64, 2

    key = jax.random.PRNGKey(0)
    k_x, k_p = jax.random.split(key)
    x = jax.random.normal(k_x, (B, S, D), jnp.float32)
    c = jnp.float32(1.0)        # scalar argument threaded through layers

    params = init_encoder_params(k_p, N_LAYERS, D, H, DFF)

    out, attns = encoder_forward(params, x, c)
    jax.block_until_ready(out)
    jax.block_until_ready(attns)

    assert out.shape == (B, S, D)
    assert attns.shape == (B, H, S, S)
    assert bool(jnp.isfinite(out).all())
    # last-layer attention rows use an exact softmax -> must sum to ~1
    assert bool(jnp.allclose(jnp.sum(attns, axis=-1), 1.0, atol=1e-2))
    print("KERNEL_OK")
</pallas_src>

<mosaic_0001>
module attributes {stable_mosaic.version = 11 : i64} {
  func.func @_encoder_kernel(%arg0: i32, %arg1: i32, %arg2: memref<2x8x32xf32, #tpu.memory_space<vmem>>, %arg3: memref<1x1x32xf32, #tpu.memory_space<vmem>>, %arg4: memref<1x1x32xf32, #tpu.memory_space<vmem>>, %arg5: memref<1x32x96xbf16, #tpu.memory_space<vmem>>, %arg6: memref<1x1x96xf32, #tpu.memory_space<vmem>>, %arg7: memref<1x32x32xbf16, #tpu.memory_space<vmem>>, %arg8: memref<1x1x32xf32, #tpu.memory_space<vmem>>, %arg9: memref<1x1x32xf32, #tpu.memory_space<vmem>>, %arg10: memref<1x1x32xf32, #tpu.memory_space<vmem>>, %arg11: memref<1x32x64xbf16, #tpu.memory_space<vmem>>, %arg12: memref<1x1x64xf32, #tpu.memory_space<vmem>>, %arg13: memref<1x64x32xbf16, #tpu.memory_space<vmem>>, %arg14: memref<1x1x32xf32, #tpu.memory_space<vmem>>, %arg15: memref<1x32xf32, #tpu.memory_space<vmem>>, %arg16: memref<1x32xf32, #tpu.memory_space<vmem>>, %arg17: memref<2x8x32xf32, #tpu.memory_space<vmem>>, %arg18: memref<2x4x8x8xf32, #tpu.memory_space<vmem>>, %arg19: memref<16x32xf32, #tpu.memory_space<vmem>>) attributes {dimension_semantics = [#tpu.dimension_semantics<parallel>, #tpu.dimension_semantics<arbitrary>], iteration_bounds = array<i64: 1, 2>, scalar_prefetch = 0 : i64, scratch_operands = 1 : i64, tpu.core_type = #tpu.core_type<tc>, window_params = [{transform_indices = @transform_0, window_bounds = array<i64: 2, 8, 32>}, {transform_indices = @transform_1, window_bounds = array<i64: 1, 1, 32>}, {transform_indices = @transform_2, window_bounds = array<i64: 1, 1, 32>}, {transform_indices = @transform_3, window_bounds = array<i64: 1, 32, 96>}, {transform_indices = @transform_4, window_bounds = array<i64: 1, 1, 96>}, {transform_indices = @transform_5, window_bounds = array<i64: 1, 32, 32>}, {transform_indices = @transform_6, window_bounds = array<i64: 1, 1, 32>}, {transform_indices = @transform_7, window_bounds = array<i64: 1, 1, 32>}, {transform_indices = @transform_8, window_bounds = array<i64: 1, 1, 32>}, {transform_indices = @transform_9, window_bounds = array<i64: 1, 32, 64>}, {transform_indices = @transform_10, window_bounds = array<i64: 1, 1, 64>}, {transform_indices = @transform_11, window_bounds = array<i64: 1, 64, 32>}, {transform_indices = @transform_12, window_bounds = array<i64: 1, 1, 32>}, {pipeline_mode = #tpu.pipeline_mode<synchronous>, transform_indices = @transform_13, window_bounds = array<i64: 1, 32>}, {pipeline_mode = #tpu.pipeline_mode<synchronous>, transform_indices = @transform_14, window_bounds = array<i64: 1, 32>}, {transform_indices = @transform_15, window_bounds = array<i64: 2, 8, 32>}, {transform_indices = @transform_16, window_bounds = array<i64: 2, 4, 8, 8>}]} {
    %c0_i32 = arith.constant 0 : i32
    %0 = arith.cmpi eq, %arg1, %c0_i32 : i32
    %1 = arith.extui %0 : i1 to i32
    %c0_i32_0 = arith.constant 0 : i32
    %2 = arith.cmpi ne, %1, %c0_i32_0 : i32
    scf.if %2 {
      %c0_200 = arith.constant 0 : index
      %c0_201 = arith.constant 0 : index
      %c0_202 = arith.constant 0 : index
      %392 = vector.load %arg2[%c0_200, %c0_201, %c0_202] : memref<2x8x32xf32, #tpu.memory_space<vmem>>, vector<1x8x32xf32>
      %393 = vector.shape_cast %392 : vector<1x8x32xf32> to vector<8x32xf32>
      %c0_203 = arith.constant 0 : index
      %c0_204 = arith.constant 0 : index
      %394 = vector.load %arg19[%c0_203, %c0_204] : memref<16x32xf32, #tpu.memory_space<vmem>>, vector<8x32xf32>
      tpu.vector_store %arg19[%c0_203, %c0_204], %393 {strides = array<i32>} : memref<16x32xf32, #tpu.memory_space<vmem>>, vector<8x32xf32>,
      %c1 = arith.constant 1 : index
      %c0_205 = arith.constant 0 : index
      %c0_206 = arith.constant 0 : index
      %395 = vector.load %arg2[%c1, %c0_205, %c0_206] : memref<2x8x32xf32, #tpu.memory_space<vmem>>, vector<1x8x32xf32>
      %396 = vector.shape_cast %395 : vector<1x8x32xf32> to vector<8x32xf32>
      %c8_207 = arith.constant 8 : index
      %c0_208 = arith.constant 0 : index
      %397 = vector.load %arg19[%c8_207, %c0_208] : memref<16x32xf32, #tpu.memory_space<vmem>>, vector<8x32xf32>
      tpu.vector_store %arg19[%c8_207, %c0_208], %396 {strides = array<i32>} : memref<16x32xf32, #tpu.memory_space<vmem>>, vector<8x32xf32>,
    } else {
    }
    %c0 = arith.constant 0 : index
    %c0_1 = arith.constant 0 : index
    %3 = vector.load %arg19[%c0, %c0_1] : memref<16x32xf32, #tpu.memory_space<vmem>>, vector<16x32xf32>
    %c0_2 = arith.constant 0 : index
    %c0_3 = arith.constant 0 : index
    %c0_4 = arith.constant 0 : index
    %4 = vector.load %arg3[%c0_2, %c0_3, %c0_4] : memref<1x1x32xf32, #tpu.memory_space<vmem>>, vector<1x1x32xf32>
    %5 = vector.shape_cast %4 : vector<1x1x32xf32> to vector<1x32xf32>
    %c0_5 = arith.constant 0 : index
    %c0_6 = arith.constant 0 : index
    %c0_7 = arith.constant 0 : index
    %6 = vector.load %arg4[%c0_5, %c0_6, %c0_7] : memref<1x1x32xf32, #tpu.memory_space<vmem>>, vector<1x1x32xf32>
    %7 = vector.shape_cast %6 : vector<1x1x32xf32> to vector<1x32xf32>
    %cst = arith.constant dense<0.000000e+00> : vector<16xf32>
    %8 = vector.multi_reduction <add>, %3, %cst [1] : vector<16x32xf32> to vector<16xf32>
    %9 = vector.shape_cast %8 : vector<16xf32> to vector<16x1xf32>
    %cst_8 = arith.constant 3.200000e+01 : f32
    %10 = vector.broadcast %cst_8 : f32 to vector<16x1xf32>
    %11 = arith.divf %9, %10 : vector<16x1xf32>
    %12 = vector.broadcast %11 : vector<16x1xf32> to vector<16x32xf32>
    %13 = arith.subf %3, %12 : vector<16x32xf32>
    %14 = arith.mulf %13, %13 : vector<16x32xf32>
    %cst_9 = arith.constant dense<0.000000e+00> : vector<16xf32>
    %15 = vector.multi_reduction <add>, %14, %cst_9 [1] : vector<16x32xf32> to vector<16xf32>
    %16 = vector.shape_cast %15 : vector<16xf32> to vector<16x1xf32>
    %cst_10 = arith.constant 3.200000e+01 : f32
    %17 = vector.broadcast %cst_10 : f32 to vector<16x1xf32>
    %18 = arith.divf %16, %17 : vector<16x1xf32>
    %19 = vector.broadcast %11 : vector<16x1xf32> to vector<16x32xf32>
    %20 = arith.subf %3, %19 : vector<16x32xf32>
    %cst_11 = arith.constant 9.99999974E-6 : f32
    %21 = vector.broadcast %cst_11 : f32 to vector<16x1xf32>
    %22 = arith.addf %18, %21 : vector<16x1xf32>
    %23 = math.rsqrt %22 : vector<16x1xf32>
    %24 = vector.broadcast %23 : vector<16x1xf32> to vector<16x32xf32>
    %25 = arith.mulf %20, %24 : vector<16x32xf32>
    %26 = vector.broadcast %5 : vector<1x32xf32> to vector<16x32xf32>
    %27 = arith.mulf %25, %26 : vector<16x32xf32>
    %28 = vector.broadcast %7 : vector<1x32xf32> to vector<16x32xf32>
    %29 = arith.addf %27, %28 : vector<16x32xf32>
    %c0_12 = arith.constant 0 : index
    %c0_13 = arith.constant 0 : index
    %c0_14 = arith.constant 0 : index
    %30 = vector.load %arg5[%c0_12, %c0_13, %c0_14] : memref<1x32x96xbf16, #tpu.memory_space<vmem>>, vector<1x32x8xbf16>
    %31 = vector.shape_cast %30 : vector<1x32x8xbf16> to vector<32x8xbf16>
    %32 = arith.truncf %29 : vector<16x32xf32> to vector<16x32xbf16>
    %cst_15 = arith.constant dense<0.000000e+00> : vector<16x8xf32>
    %33 = tpu.matmul %32, %31, %cst_15 {dimension_numbers = #tpu.dot_dimension_numbers<[1], [0], [0], [1], [0, 0, 1, 1], [], []>} : vector<16x32xbf16>, vector<32x8xbf16>, vector<16x8xf32> -> vector<16x8xf32>
    %c0_16 = arith.constant 0 : index
    %c0_17 = arith.constant 0 : index
    %c0_18 = arith.constant 0 : index
    %34 = vector.load %arg6[%c0_16, %c0_17, %c0_18] : memref<1x1x96xf32, #tpu.memory_space<vmem>>, vector<1x1x8xf32>
    %35 = vector.shape_cast %34 : vector<1x1x8xf32> to vector<1x8xf32>
    %36 = vector.broadcast %35 : vector<1x8xf32> to vector<16x8xf32>
    %37 = arith.addf %33, %36 : vector<16x8xf32>
    %c0_19 = arith.constant 0 : index
    %c0_20 = arith.constant 0 : index
    %c32 = arith.constant 32 : index
    %38 = vector.load %arg5[%c0_19, %c0_20, %c32] : memref<1x32x96xbf16, #tpu.memory_space<vmem>>, vector<1x32x8xbf16>
    %39 = vector.shape_cast %38 : vector<1x32x8xbf16> to vector<32x8xbf16>
    %40 = arith.truncf %29 : vector<16x32xf32> to vector<16x32xbf16>
    %cst_21 = arith.constant dense<0.000000e+00> : vector<16x8xf32>
    %41 = tpu.matmul %40, %39, %cst_21 {dimension_numbers = #tpu.dot_dimension_numbers<[1], [0], [0], [1], [0, 0, 1, 1], [], []>} : vector<16x32xbf16>, vector<32x8xbf16>, vector<16x8xf32> -> vector<16x8xf32>
    %c0_22 = arith.constant 0 : index
    %c0_23 = arith.constant 0 : index
    %c32_24 = arith.constant 32 : index
    %42 = vector.load %arg6[%c0_22, %c0_23, %c32_24] : memref<1x1x96xf32, #tpu.memory_space<vmem>>, vector<1x1x8xf32>
    %43 = vector.shape_cast %42 : vector<1x1x8xf32> to vector<1x8xf32>
    %44 = vector.broadcast %43 : vector<1x8xf32> to vector<16x8xf32>
    %45 = arith.addf %41, %44 : vector<16x8xf32>
    %c0_25 = arith.constant 0 : index
    %c0_26 = arith.constant 0 : index
    %c64 = arith.constant 64 : index
    %46 = vector.load %arg5[%c0_25, %c0_26, %c64] : memref<1x32x96xbf16, #tpu.memory_space<vmem>>, vector<1x32x8xbf16>
    %47 = vector.shape_cast %46 : vector<1x32x8xbf16> to vector<32x8xbf16>
    %48 = arith.truncf %29 : vector<16x32xf32> to vector<16x32xbf16>
    %cst_27 = arith.constant dense<0.000000e+00> : vector<16x8xf32>
    %49 = tpu.matmul %48, %47, %cst_27 {dimension_numbers = #tpu.dot_dimension_numbers<[1], [0], [0], [1], [0, 0, 1, 1], [], []>} : vector<16x32xbf16>, vector<32x8xbf16>, vector<16x8xf32> -> vector<16x8xf32>
    %c0_28 = arith.constant 0 : index
    %c0_29 = arith.constant 0 : index
    %c64_30 = arith.constant 64 : index
    %50 = vector.load %arg6[%c0_28, %c0_29, %c64_30] : memref<1x1x96xf32, #tpu.memory_space<vmem>>, vector<1x1x8xf32>
    %51 = vector.shape_cast %50 : vector<1x1x8xf32> to vector<1x8xf32>
    %52 = vector.broadcast %51 : vector<1x8xf32> to vector<16x8xf32>
    %53 = arith.addf %49, %52 : vector<16x8xf32>
    %c0_31 = arith.constant 0 : index
    %c0_32 = arith.constant 0 : index
    %c8 = arith.constant 8 : index
    %54 = vector.load %arg5[%c0_31, %c0_32, %c8] : memref<1x32x96xbf16, #tpu.memory_space<vmem>>, vector<1x32x8xbf16>
    %55 = vector.shape_cast %54 : vector<1x32x8xbf16> to vector<32x8xbf16>
    %56 = arith.truncf %29 : vector<16x32xf32> to vector<16x32xbf16>
    %cst_33 = arith.constant dense<0.000000e+00> : vector<16x8xf32>
    %57 = tpu.matmul %56, %55, %cst_33 {dimension_numbers = #tpu.dot_dimension_numbers<[1], [0], [0], [1], [0, 0, 1, 1], [], []>} : vector<16x32xbf16>, vector<32x8xbf16>, vector<16x8xf32> -> vector<16x8xf32>
    %c0_34 = arith.constant 0 : index
    %c0_35 = arith.constant 0 : index
    %c8_36 = arith.constant 8 : index
    %58 = vector.load %arg6[%c0_34, %c0_35, %c8_36] : memref<1x1x96xf32, #tpu.memory_space<vmem>>, vector<1x1x8xf32>
    %59 = vector.shape_cast %58 : vector<1x1x8xf32> to vector<1x8xf32>
    %60 = vector.broadcast %59 : vector<1x8xf32> to vector<16x8xf32>
    %61 = arith.addf %57, %60 : vector<16x8xf32>
    %c0_37 = arith.constant 0 : index
    %c0_38 = arith.constant 0 : index
    %c40 = arith.constant 40 : index
    %62 = vector.load %arg5[%c0_37, %c0_38, %c40] : memref<1x32x96xbf16, #tpu.memory_space<vmem>>, vector<1x32x8xbf16>
    %63 = vector.shape_cast %62 : vector<1x32x8xbf16> to vector<32x8xbf16>
    %64 = arith.truncf %29 : vector<16x32xf32> to vector<16x32xbf16>
    %cst_39 = arith.constant dense<0.000000e+00> : vector<16x8xf32>
    %65 = tpu.matmul %64, %63, %cst_39 {dimension_numbers = #tpu.dot_dimension_numbers<[1], [0], [0], [1], [0, 0, 1, 1], [], []>} : vector<16x32xbf16>, vector<32x8xbf16>, vector<16x8xf32> -> vector<16x8xf32>
    %c0_40 = arith.constant 0 : index
    %c0_41 = arith.constant 0 : index
    %c40_42 = arith.constant 40 : index
    %66 = vector.load %arg6[%c0_40, %c0_41, %c40_42] : memref<1x1x96xf32, #tpu.memory_space<vmem>>, vector<1x1x8xf32>
    %67 = vector.shape_cast %66 : vector<1x1x8xf32> to vector<1x8xf32>
    %68 = vector.broadcast %67 : vector<1x8xf32> to vector<16x8xf32>
    %69 = arith.addf %65, %68 : vector<16x8xf32>
    %c0_43 = arith.constant 0 : index
    %c0_44 = arith.constant 0 : index
    %c72 = arith.constant 72 : index
    %70 = vector.load %arg5[%c0_43, %c0_44, %c72] : memref<1x32x96xbf16, #tpu.memory_space<vmem>>, vector<1x32x8xbf16>
    %71 = vector.shape_cast %70 : vector<1x32x8xbf16> to vector<32x8xbf16>
    %72 = arith.truncf %29 : vector<16x32xf32> to vector<16x32xbf16>
    %cst_45 = arith.constant dense<0.000000e+00> : vector<16x8xf32>
    %73 = tpu.matmul %72, %71, %cst_45 {dimension_numbers = #tpu.dot_dimension_numbers<[1], [0], [0], [1], [0, 0, 1, 1], [], []>} : vector<16x32xbf16>, vector<32x8xbf16>, vector<16x8xf32> -> vector<16x8xf32>
    %c0_46 = arith.constant 0 : index
    %c0_47 = arith.constant 0 : index
    %c72_48 = arith.constant 72 : index
    %74 = vector.load %arg6[%c0_46, %c0_47, %c72_48] : memref<1x1x96xf32, #tpu.memory_space<vmem>>, vector<1x1x8xf32>
    %75 = vector.shape_cast %74 : vector<1x1x8xf32> to vector<1x8xf32>
    %76 = vector.broadcast %75 : vector<1x8xf32> to vector<16x8xf32>
    %77 = arith.addf %73, %76 : vector<16x8xf32>
    %c0_49 = arith.constant 0 : index
    %c0_50 = arith.constant 0 : index
    %c16 = arith.constant 16 : index
    %78 = vector.load %arg5[%c0_49, %c0_50, %c16] : memref<1x32x96xbf16, #tpu.memory_space<vmem>>, vector<1x32x8xbf16>
    %79 = vector.shape_cast %78 : vector<1x32x8xbf16> to vector<32x8xbf16>
    %80 = arith.truncf %29 : vector<16x32xf32> to vector<16x32xbf16>
    %cst_51 = arith.constant dense<0.000000e+00> : vector<16x8xf32>
    %81 = tpu.matmul %80, %79, %cst_51 {dimension_numbers = #tpu.dot_dimension_numbers<[1], [0], [0], [1], [0, 0, 1, 1], [], []>} : vector<16x32xbf16>, vector<32x8xbf16>, vector<16x8xf32> -> vector<16x8xf32>
    %c0_52 = arith.constant 0 : index
    %c0_53 = arith.constant 0 : index
    %c16_54 = arith.constant 16 : index
    %82 = vector.load %arg6[%c0_52, %c0_53, %c16_54] : memref<1x1x96xf32, #tpu.memory_space<vmem>>, vector<1x1x8xf32>
    %83 = vector.shape_cast %82 : vector<1x1x8xf32> to vector<1x8xf32>
    %84 = vector.broadcast %83 : vector<1x8xf32> to vector<16x8xf32>
    %85 = arith.addf %81, %84 : vector<16x8xf32>
    %c0_55 = arith.constant 0 : index
    %c0_56 = arith.constant 0 : index
    %c48 = arith.constant 48 : index
    %86 = vector.load %arg5[%c0_55, %c0_56, %c48] : memref<1x32x96xbf16, #tpu.memory_space<vmem>>, vector<1x32x8xbf16>
    %87 = vector.shape_cast %86 : vector<1x32x8xbf16> to vector<32x8xbf16>
    %88 = arith.truncf %29 : vector<16x32xf32> to vector<16x32xbf16>
    %cst_57 = arith.constant dense<0.000000e+00> : vector<16x8xf32>
    %89 = tpu.matmul %88, %87, %cst_57 {dimension_numbers = #tpu.dot_dimension_numbers<[1], [0], [0], [1], [0, 0, 1, 1], [], []>} : vector<16x32xbf16>, vector<32x8xbf16>, vector<16x8xf32> -> vector<16x8xf32>
    %c0_58 = arith.constant 0 : index
    %c0_59 = arith.constant 0 : index
    %c48_60 = arith.constant 48 : index
    %90 = vector.load %arg6[%c0_58, %c0_59, %c48_60] : memref<1x1x96xf32, #tpu.memory_space<vmem>>, vector<1x1x8xf32>
    %91 = vector.shape_cast %90 : vector<1x1x8xf32> to vector<1x8xf32>
    %92 = vector.broadcast %91 : vector<1x8xf32> to vector<16x8xf32>
    %93 = arith.addf %89, %92 : vector<16x8xf32>
    %c0_61 = arith.constant 0 : index
    %c0_62 = arith.constant 0 : index
    %c80 = arith.constant 80 : index
    %94 = vector.load %arg5[%c0_61, %c0_62, %c80] : memref<1x32x96xbf16, #tpu.memory_space<vmem>>, vector<1x32x8xbf16>
    %95 = vector.shape_cast %94 : vector<1x32x8xbf16> to vector<32x8xbf16>
    %96 = arith.truncf %29 : vector<16x32xf32> to vector<16x32xbf16>
    %cst_63 = arith.constant dense<0.000000e+00> : vector<16x8xf32>
    %97 = tpu.matmul %96, %95, %cst_63 {dimension_numbers = #tpu.dot_dimension_numbers<[1], [0], [0], [1], [0, 0, 1, 1], [], []>} : vector<16x32xbf16>, vector<32x8xbf16>, vector<16x8xf32> -> vector<16x8xf32>
    %c0_64 = arith.constant 0 : index
    %c0_65 = arith.constant 0 : index
    %c80_66 = arith.constant 80 : index
    %98 = vector.load %arg6[%c0_64, %c0_65, %c80_66] : memref<1x1x96xf32, #tpu.memory_space<vmem>>, vector<1x1x8xf32>
    %99 = vector.shape_cast %98 : vector<1x1x8xf32> to vector<1x8xf32>
    %100 = vector.broadcast %99 : vector<1x8xf32> to vector<16x8xf32>
    %101 = arith.addf %97, %100 : vector<16x8xf32>
    %c0_67 = arith.constant 0 : index
    %c0_68 = arith.constant 0 : index
    %c24 = arith.constant 24 : index
    %102 = vector.load %arg5[%c0_67, %c0_68, %c24] : memref<1x32x96xbf16, #tpu.memory_space<vmem>>, vector<1x32x8xbf16>
    %103 = vector.shape_cast %102 : vector<1x32x8xbf16> to vector<32x8xbf16>
    %104 = arith.truncf %29 : vector<16x32xf32> to vector<16x32xbf16>
    %cst_69 = arith.constant dense<0.000000e+00> : vector<16x8xf32>
    %105 = tpu.matmul %104, %103, %cst_69 {dimension_numbers = #tpu.dot_dimension_numbers<[1], [0], [0], [1], [0, 0, 1, 1], [], []>} : vector<16x32xbf16>, vector<32x8xbf16>, vector<16x8xf32> -> vector<16x8xf32>
    %c0_70 = arith.constant 0 : index
    %c0_71 = arith.constant 0 : index
    %c24_72 = arith.constant 24 : index
    %106 = vector.load %arg6[%c0_70, %c0_71, %c24_72] : memref<1x1x96xf32, #tpu.memory_space<vmem>>, vector<1x1x8xf32>
    %107 = vector.shape_cast %106 : vector<1x1x8xf32> to vector<1x8xf32>
    %108 = vector.broadcast %107 : vector<1x8xf32> to vector<16x8xf32>
    %109 = arith.addf %105, %108 : vector<16x8xf32>
    %c0_73 = arith.constant 0 : index
    %c0_74 = arith.constant 0 : index
    %c56 = arith.constant 56 : index
    %110 = vector.load %arg5[%c0_73, %c0_74, %c56] : memref<1x32x96xbf16, #tpu.memory_space<vmem>>, vector<1x32x8xbf16>
    %111 = vector.shape_cast %110 : vector<1x32x8xbf16> to vector<32x8xbf16>
    %112 = arith.truncf %29 : vector<16x32xf32> to vector<16x32xbf16>
    %cst_75 = arith.constant dense<0.000000e+00> : vector<16x8xf32>
    %113 = tpu.matmul %112, %111, %cst_75 {dimension_numbers = #tpu.dot_dimension_numbers<[1], [0], [0], [1], [0, 0, 1, 1], [], []>} : vector<16x32xbf16>, vector<32x8xbf16>, vector<16x8xf32> -> vector<16x8xf32>
    %c0_76 = arith.constant 0 : index
    %c0_77 = arith.constant 0 : index
    %c56_78 = arith.constant 56 : index
    %114 = vector.load %arg6[%c0_76, %c0_77, %c56_78] : memref<1x1x96xf32, #tpu.memory_space<vmem>>, vector<1x1x8xf32>
    %115 = vector.shape_cast %114 : vector<1x1x8xf32> to vector<1x8xf32>
    %116 = vector.broadcast %115 : vector<1x8xf32> to vector<16x8xf32>
    %117 = arith.addf %113, %116 : vector<16x8xf32>
    %c0_79 = arith.constant 0 : index
    %c0_80 = arith.constant 0 : index
    %c88 = arith.constant 88 : index
    %118 = vector.load %arg5[%c0_79, %c0_80, %c88] : memref<1x32x96xbf16, #tpu.memory_space<vmem>>, vector<1x32x8xbf16>
    %119 = vector.shape_cast %118 : vector<1x32x8xbf16> to vector<32x8xbf16>
    %120 = arith.truncf %29 : vector<16x32xf32> to vector<16x32xbf16>
    %cst_81 = arith.constant dense<0.000000e+00> : vector<16x8xf32>
    %121 = tpu.matmul %120, %119, %cst_81 {dimension_numbers = #tpu.dot_dimension_numbers<[1], [0], [0], [1], [0, 0, 1, 1], [], []>} : vector<16x32xbf16>, vector<32x8xbf16>, vector<16x8xf32> -> vector<16x8xf32>
    %c0_82 = arith.constant 0 : index
    %c0_83 = arith.constant 0 : index
    %c88_84 = arith.constant 88 : index
    %122 = vector.load %arg6[%c0_82, %c0_83, %c88_84] : memref<1x1x96xf32, #tpu.memory_space<vmem>>, vector<1x1x8xf32>
    %123 = vector.shape_cast %122 : vector<1x1x8xf32> to vector<1x8xf32>
    %124 = vector.broadcast %123 : vector<1x8xf32> to vector<16x8xf32>
    %125 = arith.addf %121, %124 : vector<16x8xf32>
    %cst_85 = arith.constant 0.000000e+00 : f32
    %126 = vector.broadcast %cst_85 : f32 to vector<8x32xf32>
    %127 = vector.extract_strided_slice %37 {offsets = [0, 0], sizes = [8, 8], strides = [1, 1]} : vector<16x8xf32> to vector<8x8xf32>
    %128 = vector.extract_strided_slice %45 {offsets = [0, 0], sizes = [8, 8], strides = [1, 1]} : vector<16x8xf32> to vector<8x8xf32>
    %129 = arith.truncf %127 : vector<8x8xf32> to vector<8x8xbf16>
    %130 = arith.truncf %128 : vector<8x8xf32> to vector<8x8xbf16>
    %cst_86 = arith.constant dense<0.000000e+00> : vector<8x8xf32>
    %131 = tpu.matmul %129, %130, %cst_86 {dimension_numbers = #tpu.dot_dimension_numbers<[1], [1], [0], [0], [0, 0, 1, 0], [], []>} : vector<8x8xbf16>, vector<8x8xbf16>, vector<8x8xf32> -> vector<8x8xf32>
    %cst_87 = arith.constant 0.353553385 : f32
    %132 = vector.broadcast %cst_87 : f32 to vector<8x8xf32>
    %133 = arith.mulf %131, %132 : vector<8x8xf32>
    %cst_88 = arith.constant dense<0xFF800000> : vector<8xf32>
    %134 = vector.multi_reduction <maximumf>, %133, %cst_88 [1] : vector<8x8xf32> to vector<8xf32>
    %135 = vector.shape_cast %134 : vector<8xf32> to vector<8x1xf32>
    %136 = vector.broadcast %135 : vector<8x1xf32> to vector<8x8xf32>
    %137 = arith.subf %133, %136 : vector<8x8xf32>
    %138 = math.exp %137 : vector<8x8xf32>
    %cst_89 = arith.constant dense<0.000000e+00> : vector<8xf32>
    %139 = vector.multi_reduction <add>, %138, %cst_89 [1] : vector<8x8xf32> to vector<8xf32>
    %140 = vector.shape_cast %139 : vector<8xf32> to vector<8x1xf32>
    %141 = vector.broadcast %140 : vector<8x1xf32> to vector<8x8xf32>
    %142 = arith.divf %138, %141 : vector<8x8xf32>
    %143 = vector.extract_strided_slice %53 {offsets = [0, 0], sizes = [8, 8], strides = [1, 1]} : vector<16x8xf32> to vector<8x8xf32>
    %144 = arith.truncf %142 : vector<8x8xf32> to vector<8x8xbf16>
    %145 = arith.truncf %143 : vector<8x8xf32> to vector<8x8xbf16>
    %cst_90 = arith.constant dense<0.000000e+00> : vector<8x8xf32>
    %146 = tpu.matmul %144, %145, %cst_90 {dimension_numbers = #tpu.dot_dimension_numbers<[1], [0], [0], [1], [0, 0, 1, 1], [], []>} : vector<8x8xbf16>, vector<8x8xbf16>, vector<8x8xf32> -> vector<8x8xf32>
    %c0_91 = arith.constant 0 : index
    %c0_92 = arith.constant 0 : index
    %c0_93 = arith.constant 0 : index
    %147 = vector.load %arg7[%c0_91, %c0_92, %c0_93] : memref<1x32x32xbf16, #tpu.memory_space<vmem>>, vector<1x8x32xbf16>
    %148 = vector.shape_cast %147 : vector<1x8x32xbf16> to vector<8x32xbf16>
    %149 = arith.truncf %146 : vector<8x8xf32> to vector<8x8xbf16>
    %cst_94 = arith.constant dense<0.000000e+00> : vector<8x32xf32>
    %150 = tpu.matmul %149, %148, %cst_94 {dimension_numbers = #tpu.dot_dimension_numbers<[1], [0], [0], [1], [0, 0, 1, 1], [], []>} : vector<8x8xbf16>, vector<8x32xbf16>, vector<8x32xf32> -> vector<8x32xf32>
    %151 = arith.addf %126, %150 : vector<8x32xf32>
    %152 = vector.extract_strided_slice %61 {offsets = [0, 0], sizes = [8, 8], strides = [1, 1]} : vector<16x8xf32> to vector<8x8xf32>
    %153 = vector.extract_strided_slice %69 {offsets = [0, 0], sizes = [8, 8], strides = [1, 1]} : vector<16x8xf32> to vector<8x8xf32>
    %154 = arith.truncf %152 : vector<8x8xf32> to vector<8x8xbf16>
    %155 = arith.truncf %153 : vector<8x8xf32> to vector<8x8xbf16>
    %cst_95 = arith.constant dense<0.000000e+00> : vector<8x8xf32>
    %156 = tpu.matmul %154, %155, %cst_95 {dimension_numbers = #tpu.dot_dimension_numbers<[1], [1], [0], [0], [0, 0, 1, 0], [], []>} : vector<8x8xbf16>, vector<8x8xbf16>, vector<8x8xf32> -> vector<8x8xf32>
    %cst_96 = arith.constant 0.353553385 : f32
    %157 = vector.broadcast %cst_96 : f32 to vector<8x8xf32>
    %158 = arith.mulf %156, %157 : vector<8x8xf32>
    %cst_97 = arith.constant dense<0xFF800000> : vector<8xf32>
    %159 = vector.multi_reduction <maximumf>, %158, %cst_97 [1] : vector<8x8xf32> to vector<8xf32>
    %160 = vector.shape_cast %159 : vector<8xf32> to vector<8x1xf32>
    %161 = vector.broadcast %160 : vector<8x1xf32> to vector<8x8xf32>
    %162 = arith.subf %158, %161 : vector<8x8xf32>
    %163 = math.exp %162 : vector<8x8xf32>
    %cst_98 = arith.constant dense<0.000000e+00> : vector<8xf32>
    %164 = vector.multi_reduction <add>, %163, %cst_98 [1] : vector<8x8xf32> to vector<8xf32>
    %165 = vector.shape_cast %164 : vector<8xf32> to vector<8x1xf32>
    %166 = vector.broadcast %165 : vector<8x1xf32> to vector<8x8xf32>
    %167 = arith.divf %163, %166 : vector<8x8xf32>
    %168 = vector.extract_strided_slice %77 {offsets = [0, 0], sizes = [8, 8], strides = [1, 1]} : vector<16x8xf32> to vector<8x8xf32>
    %169 = arith.truncf %167 : vector<8x8xf32> to vector<8x8xbf16>
    %170 = arith.truncf %168 : vector<8x8xf32> to vector<8x8xbf16>
    %cst_99 = arith.constant dense<0.000000e+00> : vector<8x8xf32>
    %171 = tpu.matmul %169, %170, %cst_99 {dimension_numbers = #tpu.dot_dimension_numbers<[1], [0], [0], [1], [0, 0, 1, 1], [], []>} : vector<8x8xbf16>, vector<8x8xbf16>, vector<8x8xf32> -> vector<8x8xf32>
    %c0_100 = arith.constant 0 : index
    %c8_101 = arith.constant 8 : index
    %c0_102 = arith.constant 0 : index
    %172 = vector.load %arg7[%c0_100, %c8_101, %c0_102] : memref<1x32x32xbf16, #tpu.memory_space<vmem>>, vector<1x8x32xbf16>
    %173 = vector.shape_cast %172 : vector<1x8x32xbf16> to vector<8x32xbf16>
    %174 = arith.truncf %171 : vector<8x8xf32> to vector<8x8xbf16>
    %cst_103 = arith.constant dense<0.000000e+00> : vector<8x32xf32>
    %175 = tpu.matmul %174, %173, %cst_103 {dimension_numbers = #tpu.dot_dimension_numbers<[1], [0], [0], [1], [0, 0, 1, 1], [], []>} : vector<8x8xbf16>, vector<8x32xbf16>, vector<8x32xf32> -> vector<8x32xf32>
    %176 = arith.addf %151, %175 : vector<8x32xf32>
    %177 = vector.extract_strided_slice %85 {offsets = [0, 0], sizes = [8, 8], strides = [1, 1]} : vector<16x8xf32> to vector<8x8xf32>
    %178 = vector.extract_strided_slice %93 {offsets = [0, 0], sizes = [8, 8], strides = [1, 1]} : vector<16x8xf32> to vector<8x8xf32>
    %179 = arith.truncf %177 : vector<8x8xf32> to vector<8x8xbf16>
    %180 = arith.truncf %178 : vector<8x8xf32> to vector<8x8xbf16>
    %cst_104 = arith.constant dense<0.000000e+00> : vector<8x8xf32>
    %181 = tpu.matmul %179, %180, %cst_104 {dimension_numbers = #tpu.dot_dimension_numbers<[1], [1], [0], [0], [0, 0, 1, 0], [], []>} : vector<8x8xbf16>, vector<8x8xbf16>, vector<8x8xf32> -> vector<8x8xf32>
    %cst_105 = arith.constant 0.353553385 : f32
    %182 = vector.broadcast %cst_105 : f32 to vector<8x8xf32>
    %183 = arith.mulf %181, %182 : vector<8x8xf32>
    %cst_106 = arith.constant dense<0xFF800000> : vector<8xf32>
    %184 = vector.multi_reduction <maximumf>, %183, %cst_106 [1] : vector<8x8xf32> to vector<8xf32>
    %185 = vector.shape_cast %184 : vector<8xf32> to vector<8x1xf32>
    %186 = vector.broadcast %185 : vector<8x1xf32> to vector<8x8xf32>
    %187 = arith.subf %183, %186 : vector<8x8xf32>
    %188 = math.exp %187 : vector<8x8xf32>
    %cst_107 = arith.constant dense<0.000000e+00> : vector<8xf32>
    %189 = vector.multi_reduction <add>, %188, %cst_107 [1] : vector<8x8xf32> to vector<8xf32>
    %190 = vector.shape_cast %189 : vector<8xf32> to vector<8x1xf32>
    %191 = vector.broadcast %190 : vector<8x1xf32> to vector<8x8xf32>
    %192 = arith.divf %188, %191 : vector<8x8xf32>
    %193 = vector.extract_strided_slice %101 {offsets = [0, 0], sizes = [8, 8], strides = [1, 1]} : vector<16x8xf32> to vector<8x8xf32>
    %194 = arith.truncf %192 : vector<8x8xf32> to vector<8x8xbf16>
    %195 = arith.truncf %193 : vector<8x8xf32> to vector<8x8xbf16>
    %cst_108 = arith.constant dense<0.000000e+00> : vector<8x8xf32>
    %196 = tpu.matmul %194, %195, %cst_108 {dimension_numbers = #tpu.dot_dimension_numbers<[1], [0], [0], [1], [0, 0, 1, 1], [], []>} : vector<8x8xbf16>, vector<8x8xbf16>, vector<8x8xf32> -> vector<8x8xf32>
    %c0_109 = arith.constant 0 : index
    %c16_110 = arith.constant 16 : index
    %c0_111 = arith.constant 0 : index
    %197 = vector.load %arg7[%c0_109, %c16_110, %c0_111] : memref<1x32x32xbf16, #tpu.memory_space<vmem>>, vector<1x8x32xbf16>
    %198 = vector.shape_cast %197 : vector<1x8x32xbf16> to vector<8x32xbf16>
    %199 = arith.truncf %196 : vector<8x8xf32> to vector<8x8xbf16>
    %cst_112 = arith.constant dense<0.000000e+00> : vector<8x32xf32>
    %200 = tpu.matmul %199, %198, %cst_112 {dimension_numbers = #tpu.dot_dimension_numbers<[1], [0], [0], [1], [0, 0, 1, 1], [], []>} : vector<8x8xbf16>, vector<8x32xbf16>, vector<8x32xf32> -> vector<8x32xf32>
    %201 = arith.addf %176, %200 : vector<8x32xf32>
    %202 = vector.extract_strided_slice %109 {offsets = [0, 0], sizes = [8, 8], strides = [1, 1]} : vector<16x8xf32> to vector<8x8xf32>
    %203 = vector.extract_strided_slice %117 {offsets = [0, 0], sizes = [8, 8], strides = [1, 1]} : vector<16x8xf32> to vector<8x8xf32>
    %204 = arith.truncf %202 : vector<8x8xf32> to vector<8x8xbf16>
    %205 = arith.truncf %203 : vector<8x8xf32> to vector<8x8xbf16>
    %cst_113 = arith.constant dense<0.000000e+00> : vector<8x8xf32>
    %206 = tpu.matmul %204, %205, %cst_113 {dimension_numbers = #tpu.dot_dimension_numbers<[1], [1], [0], [0], [0, 0, 1, 0], [], []>} : vector<8x8xbf16>, vector<8x8xbf16>, vector<8x8xf32> -> vector<8x8xf32>
    %cst_114 = arith.constant 0.353553385 : f32
    %207 = vector.broadcast %cst_114 : f32 to vector<8x8xf32>
    %208 = arith.mulf %206, %207 : vector<8x8xf32>
    %cst_115 = arith.constant dense<0xFF800000> : vector<8xf32>
    %209 = vector.multi_reduction <maximumf>, %208, %cst_115 [1] : vector<8x8xf32> to vector<8xf32>
    %210 = vector.shape_cast %209 : vector<8xf32> to vector<8x1xf32>
    %211 = vector.broadcast %210 : vector<8x1xf32> to vector<8x8xf32>
    %212 = arith.subf %208, %211 : vector<8x8xf32>
    %213 = math.exp %212 : vector<8x8xf32>
    %cst_116 = arith.constant dense<0.000000e+00> : vector<8xf32>
    %214 = vector.multi_reduction <add>, %213, %cst_116 [1] : vector<8x8xf32> to vector<8xf32>
    %215 = vector.shape_cast %214 : vector<8xf32> to vector<8x1xf32>
    %216 = vector.broadcast %215 : vector<8x1xf32> to vector<8x8xf32>
    %217 = arith.divf %213, %216 : vector<8x8xf32>
    %218 = vector.extract_strided_slice %125 {offsets = [0, 0], sizes = [8, 8], strides = [1, 1]} : vector<16x8xf32> to vector<8x8xf32>
    %219 = arith.truncf %217 : vector<8x8xf32> to vector<8x8xbf16>
    %220 = arith.truncf %218 : vector<8x8xf32> to vector<8x8xbf16>
    %cst_117 = arith.constant dense<0.000000e+00> : vector<8x8xf32>
    %221 = tpu.matmul %219, %220, %cst_117 {dimension_numbers = #tpu.dot_dimension_numbers<[1], [0], [0], [1], [0, 0, 1, 1], [], []>} : vector<8x8xbf16>, vector<8x8xbf16>, vector<8x8xf32> -> vector<8x8xf32>
    %c0_118 = arith.constant 0 : index
    %c24_119 = arith.constant 24 : index
    %c0_120 = arith.constant 0 : index
    %222 = vector.load %arg7[%c0_118, %c24_119, %c0_120] : memref<1x32x32xbf16, #tpu.memory_space<vmem>>, vector<1x8x32xbf16>
    %223 = vector.shape_cast %222 : vector<1x8x32xbf16> to vector<8x32xbf16>
    %224 = arith.truncf %221 : vector<8x8xf32> to vector<8x8xbf16>
    %cst_121 = arith.constant dense<0.000000e+00> : vector<8x32xf32>
    %225 = tpu.matmul %224, %223, %cst_121 {dimension_numbers = #tpu.dot_dimension_numbers<[1], [0], [0], [1], [0, 0, 1, 1], [], []>} : vector<8x8xbf16>, vector<8x32xbf16>, vector<8x32xf32> -> vector<8x32xf32>
    %226 = arith.addf %201, %225 : vector<8x32xf32>
    %227 = vector.extract_strided_slice %3 {offsets = [0, 0], sizes = [8, 32], strides = [1, 1]} : vector<16x32xf32> to vector<8x32xf32>
    %228 = arith.addf %227, %226 : vector<8x32xf32>
    %c0_122 = arith.constant 0 : index
    %c0_123 = arith.constant 0 : index
    %c0_124 = arith.constant 0 : index
    %229 = vector.load %arg8[%c0_122, %c0_123, %c0_124] : memref<1x1x32xf32, #tpu.memory_space<vmem>>, vector<1x1x32xf32>
    %230 = vector.shape_cast %229 : vector<1x1x32xf32> to vector<1x32xf32>
    %231 = vector.broadcast %230 : vector<1x32xf32> to vector<8x32xf32>
    %232 = arith.addf %228, %231 : vector<8x32xf32>
    %c0_125 = arith.constant 0 : index
    %c0_126 = arith.constant 0 : index
    %233 = vector.load %arg19[%c0_125, %c0_126] : memref<16x32xf32, #tpu.memory_space<vmem>>, vector<8x32xf32>
    tpu.vector_store %arg19[%c0_125, %c0_126], %232 {strides = array<i32>} : memref<16x32xf32, #tpu.memory_space<vmem>>, vector<8x32xf32>,
    %cst_127 = arith.constant 0.000000e+00 : f32
    %234 = vector.broadcast %cst_127 : f32 to vector<8x32xf32>
    %235 = vector.extract_strided_slice %37 {offsets = [8, 0], sizes = [8, 8], strides = [1, 1]} : vector<16x8xf32> to vector<8x8xf32>
    %236 = vector.extract_strided_slice %45 {offsets = [8, 0], sizes = [8, 8], strides = [1, 1]} : vector<16x8xf32> to vector<8x8xf32>
    %237 = arith.truncf %235 : vector<8x8xf32> to vector<8x8xbf16>
    %238 = arith.truncf %236 : vector<8x8xf32> to vector<8x8xbf16>
    %cst_128 = arith.constant dense<0.000000e+00> : vector<8x8xf32>
    %239 = tpu.matmul %237, %238, %cst_128 {dimension_numbers = #tpu.dot_dimension_numbers<[1], [1], [0], [0], [0, 0, 1, 0], [], []>} : vector<8x8xbf16>, vector<8x8xbf16>, vector<8x8xf32> -> vector<8x8xf32>
    %cst_129 = arith.constant 0.353553385 : f32
    %240 = vector.broadcast %cst_129 : f32 to vector<8x8xf32>
    %241 = arith.mulf %239, %240 : vector<8x8xf32>
    %cst_130 = arith.constant dense<0xFF800000> : vector<8xf32>
    %242 = vector.multi_reduction <maximumf>, %241, %cst_130 [1] : vector<8x8xf32> to vector<8xf32>
    %243 = vector.shape_cast %242 : vector<8xf32> to vector<8x1xf32>
    %244 = vector.broadcast %243 : vector<8x1xf32> to vector<8x8xf32>
    %245 = arith.subf %241, %244 : vector<8x8xf32>
    %246 = math.exp %245 : vector<8x8xf32>
    %cst_131 = arith.constant dense<0.000000e+00> : vector<8xf32>
    %247 = vector.multi_reduction <add>, %246, %cst_131 [1] : vector<8x8xf32> to vector<8xf32>
    %248 = vector.shape_cast %247 : vector<8xf32> to vector<8x1xf32>
    %249 = vector.broadcast %248 : vector<8x1xf32> to vector<8x8xf32>
    %250 = arith.divf %246, %249 : vector<8x8xf32>
    %251 = vector.extract_strided_slice %53 {offsets = [8, 0], sizes = [8, 8], strides = [1, 1]} : vector<16x8xf32> to vector<8x8xf32>
    %252 = arith.truncf %250 : vector<8x8xf32> to vector<8x8xbf16>
    %253 = arith.truncf %251 : vector<8x8xf32> to vector<8x8xbf16>
    %cst_132 = arith.constant dense<0.000000e+00> : vector<8x8xf32>
    %254 = tpu.matmul %252, %253, %cst_132 {dimension_numbers = #tpu.dot_dimension_numbers<[1], [0], [0], [1], [0, 0, 1, 1], [], []>} : vector<8x8xbf16>, vector<8x8xbf16>, vector<8x8xf32> -> vector<8x8xf32>
    %c0_133 = arith.constant 0 : index
    %c0_134 = arith.constant 0 : index
    %c0_135 = arith.constant 0 : index
    %255 = vector.load %arg7[%c0_133, %c0_134, %c0_135] : memref<1x32x32xbf16, #tpu.memory_space<vmem>>, vector<1x8x32xbf16>
    %256 = vector.shape_cast %255 : vector<1x8x32xbf16> to vector<8x32xbf16>
    %257 = arith.truncf %254 : vector<8x8xf32> to vector<8x8xbf16>
    %cst_136 = arith.constant dense<0.000000e+00> : vector<8x32xf32>
    %258 = tpu.matmul %257, %256, %cst_136 {dimension_numbers = #tpu.dot_dimension_numbers<[1], [0], [0], [1], [0, 0, 1, 1], [], []>} : vector<8x8xbf16>, vector<8x32xbf16>, vector<8x32xf32> -> vector<8x32xf32>
    %259 = arith.addf %234, %258 : vector<8x32xf32>
    %260 = vector.extract_strided_slice %61 {offsets = [8, 0], sizes = [8, 8], strides = [1, 1]} : vector<16x8xf32> to vector<8x8xf32>
    %261 = vector.extract_strided_slice %69 {offsets = [8, 0], sizes = [8, 8], strides = [1, 1]} : vector<16x8xf32> to vector<8x8xf32>
    %262 = arith.truncf %260 : vector<8x8xf32> to vector<8x8xbf16>
    %263 = arith.truncf %261 : vector<8x8xf32> to vector<8x8xbf16>
    %cst_137 = arith.constant dense<0.000000e+00> : vector<8x8xf32>
    %264 = tpu.matmul %262, %263, %cst_137 {dimension_numbers = #tpu.dot_dimension_numbers<[1], [1], [0], [0], [0, 0, 1, 0], [], []>} : vector<8x8xbf16>, vector<8x8xbf16>, vector<8x8xf32> -> vector<8x8xf32>
    %cst_138 = arith.constant 0.353553385 : f32
    %265 = vector.broadcast %cst_138 : f32 to vector<8x8xf32>
    %266 = arith.mulf %264, %265 : vector<8x8xf32>
    %cst_139 = arith.constant dense<0xFF800000> : vector<8xf32>
    %267 = vector.multi_reduction <maximumf>, %266, %cst_139 [1] : vector<8x8xf32> to vector<8xf32>
    %268 = vector.shape_cast %267 : vector<8xf32> to vector<8x1xf32>
    %269 = vector.broadcast %268 : vector<8x1xf32> to vector<8x8xf32>
    %270 = arith.subf %266, %269 : vector<8x8xf32>
    %271 = math.exp %270 : vector<8x8xf32>
    %cst_140 = arith.constant dense<0.000000e+00> : vector<8xf32>
    %272 = vector.multi_reduction <add>, %271, %cst_140 [1] : vector<8x8xf32> to vector<8xf32>
    %273 = vector.shape_cast %272 : vector<8xf32> to vector<8x1xf32>
    %274 = vector.broadcast %273 : vector<8x1xf32> to vector<8x8xf32>
    %275 = arith.divf %271, %274 : vector<8x8xf32>
    %276 = vector.extract_strided_slice %77 {offsets = [8, 0], sizes = [8, 8], strides = [1, 1]} : vector<16x8xf32> to vector<8x8xf32>
    %277 = arith.truncf %275 : vector<8x8xf32> to vector<8x8xbf16>
    %278 = arith.truncf %276 : vector<8x8xf32> to vector<8x8xbf16>
    %cst_141 = arith.constant dense<0.000000e+00> : vector<8x8xf32>
    %279 = tpu.matmul %277, %278, %cst_141 {dimension_numbers = #tpu.dot_dimension_numbers<[1], [0], [0], [1], [0, 0, 1, 1], [], []>} : vector<8x8xbf16>, vector<8x8xbf16>, vector<8x8xf32> -> vector<8x8xf32>
    %c0_142 = arith.constant 0 : index
    %c8_143 = arith.constant 8 : index
    %c0_144 = arith.constant 0 : index
    %280 = vector.load %arg7[%c0_142, %c8_143, %c0_144] : memref<1x32x32xbf16, #tpu.memory_space<vmem>>, vector<1x8x32xbf16>
    %281 = vector.shape_cast %280 : vector<1x8x32xbf16> to vector<8x32xbf16>
    %282 = arith.truncf %279 : vector<8x8xf32> to vector<8x8xbf16>
    %cst_145 = arith.constant dense<0.000000e+00> : vector<8x32xf32>
    %283 = tpu.matmul %282, %281, %cst_145 {dimension_numbers = #tpu.dot_dimension_numbers<[1], [0], [0], [1], [0, 0, 1, 1], [], []>} : vector<8x8xbf16>, vector<8x32xbf16>, vector<8x32xf32> -> vector<8x32xf32>
    %284 = arith.addf %259, %283 : vector<8x32xf32>
    %285 = vector.extract_strided_slice %85 {offsets = [8, 0], sizes = [8, 8], strides = [1, 1]} : vector<16x8xf32> to vector<8x8xf32>
    %286 = vector.extract_strided_slice %93 {offsets = [8, 0], sizes = [8, 8], strides = [1, 1]} : vector<16x8xf32> to vector<8x8xf32>
    %287 = arith.truncf %285 : vector<8x8xf32> to vector<8x8xbf16>
    %288 = arith.truncf %286 : vector<8x8xf32> to vector<8x8xbf16>
    %cst_146 = arith.constant dense<0.000000e+00> : vector<8x8xf32>
    %289 = tpu.matmul %287, %288, %cst_146 {dimension_numbers = #tpu.dot_dimension_numbers<[1], [1], [0], [0], [0, 0, 1, 0], [], []>} : vector<8x8xbf16>, vector<8x8xbf16>, vector<8x8xf32> -> vector<8x8xf32>
    %cst_147 = arith.constant 0.353553385 : f32
    %290 = vector.broadcast %cst_147 : f32 to vector<8x8xf32>
    %291 = arith.mulf %289, %290 : vector<8x8xf32>
    %cst_148 = arith.constant dense<0xFF800000> : vector<8xf32>
    %292 = vector.multi_reduction <maximumf>, %291, %cst_148 [1] : vector<8x8xf32> to vector<8xf32>
    %293 = vector.shape_cast %292 : vector<8xf32> to vector<8x1xf32>
    %294 = vector.broadcast %293 : vector<8x1xf32> to vector<8x8xf32>
    %295 = arith.subf %291, %294 : vector<8x8xf32>
    %296 = math.exp %295 : vector<8x8xf32>
    %cst_149 = arith.constant dense<0.000000e+00> : vector<8xf32>
    %297 = vector.multi_reduction <add>, %296, %cst_149 [1] : vector<8x8xf32> to vector<8xf32>
    %298 = vector.shape_cast %297 : vector<8xf32> to vector<8x1xf32>
    %299 = vector.broadcast %298 : vector<8x1xf32> to vector<8x8xf32>
    %300 = arith.divf %296, %299 : vector<8x8xf32>
    %301 = vector.extract_strided_slice %101 {offsets = [8, 0], sizes = [8, 8], strides = [1, 1]} : vector<16x8xf32> to vector<8x8xf32>
    %302 = arith.truncf %300 : vector<8x8xf32> to vector<8x8xbf16>
    %303 = arith.truncf %301 : vector<8x8xf32> to vector<8x8xbf16>
    %cst_150 = arith.constant dense<0.000000e+00> : vector<8x8xf32>
    %304 = tpu.matmul %302, %303, %cst_150 {dimension_numbers = #tpu.dot_dimension_numbers<[1], [0], [0], [1], [0, 0, 1, 1], [], []>} : vector<8x8xbf16>, vector<8x8xbf16>, vector<8x8xf32> -> vector<8x8xf32>
    %c0_151 = arith.constant 0 : index
    %c16_152 = arith.constant 16 : index
    %c0_153 = arith.constant 0 : index
    %305 = vector.load %arg7[%c0_151, %c16_152, %c0_153] : memref<1x32x32xbf16, #tpu.memory_space<vmem>>, vector<1x8x32xbf16>
    %306 = vector.shape_cast %305 : vector<1x8x32xbf16> to vector<8x32xbf16>
    %307 = arith.truncf %304 : vector<8x8xf32> to vector<8x8xbf16>
    %cst_154 = arith.constant dense<0.000000e+00> : vector<8x32xf32>
    %308 = tpu.matmul %307, %306, %cst_154 {dimension_numbers = #tpu.dot_dimension_numbers<[1], [0], [0], [1], [0, 0, 1, 1], [], []>} : vector<8x8xbf16>, vector<8x32xbf16>, vector<8x32xf32> -> vector<8x32xf32>
    %309 = arith.addf %284, %308 : vector<8x32xf32>
    %310 = vector.extract_strided_slice %109 {offsets = [8, 0], sizes = [8, 8], strides = [1, 1]} : vector<16x8xf32> to vector<8x8xf32>
    %311 = vector.extract_strided_slice %117 {offsets = [8, 0], sizes = [8, 8], strides = [1, 1]} : vector<16x8xf32> to vector<8x8xf32>
    %312 = arith.truncf %310 : vector<8x8xf32> to vector<8x8xbf16>
    %313 = arith.truncf %311 : vector<8x8xf32> to vector<8x8xbf16>
    %cst_155 = arith.constant dense<0.000000e+00> : vector<8x8xf32>
    %314 = tpu.matmul %312, %313, %cst_155 {dimension_numbers = #tpu.dot_dimension_numbers<[1], [1], [0], [0], [0, 0, 1, 0], [], []>} : vector<8x8xbf16>, vector<8x8xbf16>, vector<8x8xf32> -> vector<8x8xf32>
    %cst_156 = arith.constant 0.353553385 : f32
    %315 = vector.broadcast %cst_156 : f32 to vector<8x8xf32>
    %316 = arith.mulf %314, %315 : vector<8x8xf32>
    %cst_157 = arith.constant dense<0xFF800000> : vector<8xf32>
    %317 = vector.multi_reduction <maximumf>, %316, %cst_157 [1] : vector<8x8xf32> to vector<8xf32>
    %318 = vector.shape_cast %317 : vector<8xf32> to vector<8x1xf32>
    %319 = vector.broadcast %318 : vector<8x1xf32> to vector<8x8xf32>
    %320 = arith.subf %316, %319 : vector<8x8xf32>
    %321 = math.exp %320 : vector<8x8xf32>
    %cst_158 = arith.constant dense<0.000000e+00> : vector<8xf32>
    %322 = vector.multi_reduction <add>, %321, %cst_158 [1] : vector<8x8xf32> to vector<8xf32>
    %323 = vector.shape_cast %322 : vector<8xf32> to vector<8x1xf32>
    %324 = vector.broadcast %323 : vector<8x1xf32> to vector<8x8xf32>
    %325 = arith.divf %321, %324 : vector<8x8xf32>
    %326 = vector.extract_strided_slice %125 {offsets = [8, 0], sizes = [8, 8], strides = [1, 1]} : vector<16x8xf32> to vector<8x8xf32>
    %327 = arith.truncf %325 : vector<8x8xf32> to vector<8x8xbf16>
    %328 = arith.truncf %326 : vector<8x8xf32> to vector<8x8xbf16>
    %cst_159 = arith.constant dense<0.000000e+00> : vector<8x8xf32>
    %329 = tpu.matmul %327, %328, %cst_159 {dimension_numbers = #tpu.dot_dimension_numbers<[1], [0], [0], [1], [0, 0, 1, 1], [], []>} : vector<8x8xbf16>, vector<8x8xbf16>, vector<8x8xf32> -> vector<8x8xf32>
    %c0_160 = arith.constant 0 : index
    %c24_161 = arith.constant 24 : index
    %c0_162 = arith.constant 0 : index
    %330 = vector.load %arg7[%c0_160, %c24_161, %c0_162] : memref<1x32x32xbf16, #tpu.memory_space<vmem>>, vector<1x8x32xbf16>
    %331 = vector.shape_cast %330 : vector<1x8x32xbf16> to vector<8x32xbf16>
    %332 = arith.truncf %329 : vector<8x8xf32> to vector<8x8xbf16>
    %cst_163 = arith.constant dense<0.000000e+00> : vector<8x32xf32>
    %333 = tpu.matmul %332, %331, %cst_163 {dimension_numbers = #tpu.dot_dimension_numbers<[1], [0], [0], [1], [0, 0, 1, 1], [], []>} : vector<8x8xbf16>, vector<8x32xbf16>, vector<8x32xf32> -> vector<8x32xf32>
    %334 = arith.addf %309, %333 : vector<8x32xf32>
    %335 = vector.extract_strided_slice %3 {offsets = [8, 0], sizes = [8, 32], strides = [1, 1]} : vector<16x32xf32> to vector<8x32xf32>
    %336 = arith.addf %335, %334 : vector<8x32xf32>
    %c0_164 = arith.constant 0 : index
    %c0_165 = arith.constant 0 : index
    %c0_166 = arith.constant 0 : index
    %337 = vector.load %arg8[%c0_164, %c0_165, %c0_166] : memref<1x1x32xf32, #tpu.memory_space<vmem>>, vector<1x1x32xf32>
    %338 = vector.shape_cast %337 : vector<1x1x32xf32> to vector<1x32xf32>
    %339 = vector.broadcast %338 : vector<1x32xf32> to vector<8x32xf32>
    %340 = arith.addf %336, %339 : vector<8x32xf32>
    %c8_167 = arith.constant 8 : index
    %c0_168 = arith.constant 0 : index
    %341 = vector.load %arg19[%c8_167, %c0_168] : memref<16x32xf32, #tpu.memory_space<vmem>>, vector<8x32xf32>
    tpu.vector_store %arg19[%c8_167, %c0_168], %340 {strides = array<i32>} : memref<16x32xf32, #tpu.memory_space<vmem>>, vector<8x32xf32>,
    %c0_169 = arith.constant 0 : index
    %c0_170 = arith.constant 0 : index
    %342 = vector.load %arg19[%c0_169, %c0_170] : memref<16x32xf32, #tpu.memory_space<vmem>>, vector<16x32xf32>
    %c0_171 = arith.constant 0 : index
    %c0_172 = arith.constant 0 : index
    %c0_173 = arith.constant 0 : index
    %343 = vector.load %arg9[%c0_171, %c0_172, %c0_173] : memref<1x1x32xf32, #tpu.memory_space<vmem>>, vector<1x1x32xf32>
    %344 = vector.shape_cast %343 : vector<1x1x32xf32> to vector<1x32xf32>
    %c0_174 = arith.constant 0 : index
    %c0_175 = arith.constant 0 : index
    %c0_176 = arith.constant 0 : index
    %345 = vector.load %arg10[%c0_174, %c0_175, %c0_176] : memref<1x1x32xf32, #tpu.memory_space<vmem>>, vector<1x1x32xf32>
    %346 = vector.shape_cast %345 : vector<1x1x32xf32> to vector<1x32xf32>
    %cst_177 = arith.constant dense<0.000000e+00> : vector<16xf32>
    %347 = vector.multi_reduction <add>, %342, %cst_177 [1] : vector<16x32xf32> to vector<16xf32>
    %348 = vector.shape_cast %347 : vector<16xf32> to vector<16x1xf32>
    %cst_178 = arith.constant 3.200000e+01 : f32
    %349 = vector.broadcast %cst_178 : f32 to vector<16x1xf32>
    %350 = arith.divf %348, %349 : vector<16x1xf32>
    %351 = vector.broadcast %350 : vector<16x1xf32> to vector<16x32xf32>
    %352 = arith.subf %342, %351 : vector<16x32xf32>
    %353 = arith.mulf %352, %352 : vector<16x32xf32>
    %cst_179 = arith.constant dense<0.000000e+00> : vector<16xf32>
    %354 = vector.multi_reduction <add>, %353, %cst_179 [1] : vector<16x32xf32> to vector<16xf32>
    %355 = vector.shape_cast %354 : vector<16xf32> to vector<16x1xf32>
    %cst_180 = arith.constant 3.200000e+01 : f32
    %356 = vector.broadcast %cst_180 : f32 to vector<16x1xf32>
    %357 = arith.divf %355, %356 : vector<16x1xf32>
    %358 = vector.broadcast %350 : vector<16x1xf32> to vector<16x32xf32>
    %359 = arith.subf %342, %358 : vector<16x32xf32>
    %cst_181 = arith.constant 9.99999974E-6 : f32
    %360 = vector.broadcast %cst_181 : f32 to vector<16x1xf32>
    %361 = arith.addf %357, %360 : vector<16x1xf32>
    %362 = math.rsqrt %361 : vector<16x1xf32>
    %363 = vector.broadcast %362 : vector<16x1xf32> to vector<16x32xf32>
    %364 = arith.mulf %359, %363 : vector<16x32xf32>
    %365 = vector.broadcast %344 : vector<1x32xf32> to vector<16x32xf32>
    %366 = arith.mulf %364, %365 : vector<16x32xf32>
    %367 = vector.broadcast %346 : vector<1x32xf32> to vector<16x32xf32>
    %368 = arith.addf %366, %367 : vector<16x32xf32>
    %c0_182 = arith.constant 0 : index
    %c0_183 = arith.constant 0 : index
    %c0_184 = arith.constant 0 : index
    %369 = vector.load %arg11[%c0_182, %c0_183, %c0_184] : memref<1x32x64xbf16, #tpu.memory_space<vmem>>, vector<1x32x64xbf16>
    %370 = vector.shape_cast %369 : vector<1x32x64xbf16> to vector<32x64xbf16>
    %371 = arith.truncf %368 : vector<16x32xf32> to vector<16x32xbf16>
    %cst_185 = arith.constant dense<0.000000e+00> : vector<16x64xf32>
    %372 = tpu.matmul %371, %370, %cst_185 {dimension_numbers = #tpu.dot_dimension_numbers<[1], [0], [0], [1], [0, 0, 1, 1], [], []>} : vector<16x32xbf16>, vector<32x64xbf16>, vector<16x64xf32> -> vector<16x64xf32>
    %c0_186 = arith.constant 0 : index
    %c0_187 = arith.constant 0 : index
    %c0_188 = arith.constant 0 : index
    %373 = vector.load %arg12[%c0_186, %c0_187, %c0_188] : memref<1x1x64xf32, #tpu.memory_space<vmem>>, vector<1x1x64xf32>
    %374 = vector.shape_cast %373 : vector<1x1x64xf32> to vector<1x64xf32>
    %375 = vector.broadcast %374 : vector<1x64xf32> to vector<16x64xf32>
    %376 = arith.addf %372, %375 : vector<16x64xf32>
    %cst_189 = arith.constant 0.000000e+00 : f32
    %377 = vector.broadcast %cst_189 : f32 to vector<16x64xf32>
    %378 = arith.maximumf %376, %377 : vector<16x64xf32>
    %c0_190 = arith.constant 0 : index
    %c0_191 = arith.constant 0 : index
    %c0_192 = arith.constant 0 : index
    %379 = vector.load %arg13[%c0_190, %c0_191, %c0_192] : memref<1x64x32xbf16, #tpu.memory_space<vmem>>, vector<1x64x32xbf16>
    %380 = vector.shape_cast %379 : vector<1x64x32xbf16> to vector<64x32xbf16>
    %381 = arith.truncf %378 : vector<16x64xf32> to vector<16x64xbf16>
    %cst_193 = arith.constant dense<0.000000e+00> : vector<16x32xf32>
    %382 = tpu.matmul %381, %380, %cst_193 {dimension_numbers = #tpu.dot_dimension_numbers<[1], [0], [0], [1], [0, 0, 1, 1], [], []>} : vector<16x64xbf16>, vector<64x32xbf16>, vector<16x32xf32> -> vector<16x32xf32>
    %383 = arith.addf %342, %382 : vector<16x32xf32>
    %c0_194 = arith.constant 0 : index
    %c0_195 = arith.constant 0 : index
    %c0_196 = arith.constant 0 : index
    %384 = vector.load %arg14[%c0_194, %c0_195, %c0_196] : memref<1x1x32xf32, #tpu.memory_space<vmem>>, vector<1x1x32xf32>
    %385 = vector.shape_cast %384 : vector<1x1x32xf32> to vector<1x32xf32>
    %386 = vector.broadcast %385 : vector<1x32xf32> to vector<16x32xf32>
    %387 = arith.addf %383, %386 : vector<16x32xf32>
    %c0_197 = arith.constant 0 : index
    %c0_198 = arith.constant 0 : index
    %388 = vector.load %arg19[%c0_197, %c0_198] : memref<16x32xf32, #tpu.memory_space<vmem>>, vector<16x32xf32>
    tpu.vector_store %arg19[%c0_197, %c0_198], %387 {strides = array<i32>} : memref<16x32xf32, #tpu.memory_space<vmem>>, vector<16x32xf32>,
    %c1_i32 = arith.constant 1 : i32
    %389 = arith.cmpi eq, %arg1, %c1_i32 : i32
    %390 = arith.extui %389 : i1 to i32
    %c0_i32_199 = arith.constant 0 : i32
    %391 = arith.cmpi ne, %390, %c0_i32_199 : i32
    scf.if %391 {
      %c0_200 = arith.constant 0 : index
      %c0_201 = arith.constant 0 : index
      %392 = vector.load %arg15[%c0_200, %c0_201] : memref<1x32xf32, #tpu.memory_space<vmem>>, vector<1x32xf32>
      %c0_202 = arith.constant 0 : index
      %c0_203 = arith.constant 0 : index
      %393 = vector.load %arg16[%c0_202, %c0_203] : memref<1x32xf32, #tpu.memory_space<vmem>>, vector<1x32xf32>
      %cst_204 = arith.constant dense<0.000000e+00> : vector<16xf32>
      %394 = vector.multi_reduction <add>, %387, %cst_204 [1] : vector<16x32xf32> to vector<16xf32>
      %395 = vector.shape_cast %394 : vector<16xf32> to vector<16x1xf32>
      %cst_205 = arith.constant 3.200000e+01 : f32
      %396 = vector.broadcast %cst_205 : f32 to vector<16x1xf32>
      %397 = arith.divf %395, %396 : vector<16x1xf32>
      %398 = vector.broadcast %397 : vector<16x1xf32> to vector<16x32xf32>
      %399 = arith.subf %387, %398 : vector<16x32xf32>
      %400 = arith.mulf %399, %399 : vector<16x32xf32>
      %cst_206 = arith.constant dense<0.000000e+00> : vector<16xf32>
      %401 = vector.multi_reduction <add>, %400, %cst_206 [1] : vector<16x32xf32> to vector<16xf32>
      %402 = vector.shape_cast %401 : vector<16xf32> to vector<16x1xf32>
      %cst_207 = arith.constant 3.200000e+01 : f32
      %403 = vector.broadcast %cst_207 : f32 to vector<16x1xf32>
      %404 = arith.divf %402, %403 : vector<16x1xf32>
      %405 = vector.broadcast %397 : vector<16x1xf32> to vector<16x32xf32>
      %406 = arith.subf %387, %405 : vector<16x32xf32>
      %cst_208 = arith.constant 9.99999974E-6 : f32
      %407 = vector.broadcast %cst_208 : f32 to vector<16x1xf32>
      %408 = arith.addf %404, %407 : vector<16x1xf32>
      %409 = math.rsqrt %408 : vector<16x1xf32>
      %410 = vector.broadcast %409 : vector<16x1xf32> to vector<16x32xf32>
      %411 = arith.mulf %406, %410 : vector<16x32xf32>
      %412 = vector.broadcast %392 : vector<1x32xf32> to vector<16x32xf32>
      %413 = arith.mulf %411, %412 : vector<16x32xf32>
      %414 = vector.broadcast %393 : vector<1x32xf32> to vector<16x32xf32>
      %415 = arith.addf %413, %414 : vector<16x32xf32>
      %416 = vector.extract_strided_slice %415 {offsets = [0, 0], sizes = [8, 32], strides = [1, 1]} : vector<16x32xf32> to vector<8x32xf32>
      %c0_209 = arith.constant 0 : index
      %c0_210 = arith.constant 0 : index
      %c0_211 = arith.constant 0 : index
      %417 = vector.load %arg17[%c0_209, %c0_210, %c0_211] : memref<2x8x32xf32, #tpu.memory_space<vmem>>, vector<1x8x32xf32>
      %418 = vector.shape_cast %417 : vector<1x8x32xf32> to vector<8x32xf32>
      %419 = vector.shape_cast %416 : vector<8x32xf32> to vector<1x8x32xf32>
      tpu.vector_store %arg17[%c0_209, %c0_210, %c0_211], %419 {strides = array<i32>} : memref<2x8x32xf32, #tpu.memory_space<vmem>>, vector<1x8x32xf32>,
      %420 = vector.extract_strided_slice %415 {offsets = [8, 0], sizes = [8, 32], strides = [1, 1]} : vector<16x32xf32> to vector<8x32xf32>
      %c1 = arith.constant 1 : index
      %c0_212 = arith.constant 0 : index
      %c0_213 = arith.constant 0 : index
      %421 = vector.load %arg17[%c1, %c0_212, %c0_213] : memref<2x8x32xf32, #tpu.memory_space<vmem>>, vector<1x8x32xf32>
      %422 = vector.shape_cast %421 : vector<1x8x32xf32> to vector<8x32xf32>
      %423 = vector.shape_cast %420 : vector<8x32xf32> to vector<1x8x32xf32>
      tpu.vector_store %arg17[%c1, %c0_212, %c0_213], %423 {strides = array<i32>} : memref<2x8x32xf32, #tpu.memory_space<vmem>>, vector<1x8x32xf32>,
      %c0_214 = arith.constant 0 : index
      %c0_215 = arith.constant 0 : index
      %c0_216 = arith.constant 0 : index
      %c0_217 = arith.constant 0 : index
      %424 = vector.load %arg18[%c0_214, %c0_215, %c0_216, %c0_217] : memref<2x4x8x8xf32, #tpu.memory_space<vmem>>, vector<1x1x8x8xf32>
      %425 = vector.shape_cast %424 : vector<1x1x8x8xf32> to vector<8x8xf32>
      %426 = vector.shape_cast %142 : vector<8x8xf32> to vector<1x1x8x8xf32>
      tpu.vector_store %arg18[%c0_214, %c0_215, %c0_216, %c0_217], %426 {strides = array<i32>} : memref<2x4x8x8xf32, #tpu.memory_space<vmem>>, vector<1x1x8x8xf32>,
      %c0_218 = arith.constant 0 : index
      %c1_219 = arith.constant 1 : index
      %c0_220 = arith.constant 0 : index
      %c0_221 = arith.constant 0 : index
      %427 = vector.load %arg18[%c0_218, %c1_219, %c0_220, %c0_221] : memref<2x4x8x8xf32, #tpu.memory_space<vmem>>, vector<1x1x8x8xf32>
      %428 = vector.shape_cast %427 : vector<1x1x8x8xf32> to vector<8x8xf32>
      %429 = vector.shape_cast %167 : vector<8x8xf32> to vector<1x1x8x8xf32>
      tpu.vector_store %arg18[%c0_218, %c1_219, %c0_220, %c0_221], %429 {strides = array<i32>} : memref<2x4x8x8xf32, #tpu.memory_space<vmem>>, vector<1x1x8x8xf32>,
      %c0_222 = arith.constant 0 : index
      %c2 = arith.constant 2 : index
      %c0_223 = arith.constant 0 : index
      %c0_224 = arith.constant 0 : index
      %430 = vector.load %arg18[%c0_222, %c2, %c0_223, %c0_224] : memref<2x4x8x8xf32, #tpu.memory_space<vmem>>, vector<1x1x8x8xf32>
      %431 = vector.shape_cast %430 : vector<1x1x8x8xf32> to vector<8x8xf32>
      %432 = vector.shape_cast %192 : vector<8x8xf32> to vector<1x1x8x8xf32>
      tpu.vector_store %arg18[%c0_222, %c2, %c0_223, %c0_224], %432 {strides = array<i32>} : memref<2x4x8x8xf32, #tpu.memory_space<vmem>>, vector<1x1x8x8xf32>,
      %c0_225 = arith.constant 0 : index
      %c3 = arith.constant 3 : index
      %c0_226 = arith.constant 0 : index
      %c0_227 = arith.constant 0 : index
      %433 = vector.load %arg18[%c0_225, %c3, %c0_226, %c0_227] : memref<2x4x8x8xf32, #tpu.memory_space<vmem>>, vector<1x1x8x8xf32>
      %434 = vector.shape_cast %433 : vector<1x1x8x8xf32> to vector<8x8xf32>
      %435 = vector.shape_cast %217 : vector<8x8xf32> to vector<1x1x8x8xf32>
      tpu.vector_store %arg18[%c0_225, %c3, %c0_226, %c0_227], %435 {strides = array<i32>} : memref<2x4x8x8xf32, #tpu.memory_space<vmem>>, vector<1x1x8x8xf32>,
      %c1_228 = arith.constant 1 : index
      %c0_229 = arith.constant 0 : index
      %c0_230 = arith.constant 0 : index
      %c0_231 = arith.constant 0 : index
      %436 = vector.load %arg18[%c1_228, %c0_229, %c0_230, %c0_231] : memref<2x4x8x8xf32, #tpu.memory_space<vmem>>, vector<1x1x8x8xf32>
      %437 = vector.shape_cast %436 : vector<1x1x8x8xf32> to vector<8x8xf32>
      %438 = vector.shape_cast %250 : vector<8x8xf32> to vector<1x1x8x8xf32>
      tpu.vector_store %arg18[%c1_228, %c0_229, %c0_230, %c0_231], %438 {strides = array<i32>} : memref<2x4x8x8xf32, #tpu.memory_space<vmem>>, vector<1x1x8x8xf32>,
      %c1_232 = arith.constant 1 : index
      %c1_233 = arith.constant 1 : index
      %c0_234 = arith.constant 0 : index
      %c0_235 = arith.constant 0 : index
      %439 = vector.load %arg18[%c1_232, %c1_233, %c0_234, %c0_235] : memref<2x4x8x8xf32, #tpu.memory_space<vmem>>, vector<1x1x8x8xf32>
      %440 = vector.shape_cast %439 : vector<1x1x8x8xf32> to vector<8x8xf32>
      %441 = vector.shape_cast %275 : vector<8x8xf32> to vector<1x1x8x8xf32>
      tpu.vector_store %arg18[%c1_232, %c1_233, %c0_234, %c0_235], %441 {strides = array<i32>} : memref<2x4x8x8xf32, #tpu.memory_space<vmem>>, vector<1x1x8x8xf32>,
      %c1_236 = arith.constant 1 : index
      %c2_237 = arith.constant 2 : index
      %c0_238 = arith.constant 0 : index
      %c0_239 = arith.constant 0 : index
      %442 = vector.load %arg18[%c1_236, %c2_237, %c0_238, %c0_239] : memref<2x4x8x8xf32, #tpu.memory_space<vmem>>, vector<1x1x8x8xf32>
      %443 = vector.shape_cast %442 : vector<1x1x8x8xf32> to vector<8x8xf32>
      %444 = vector.shape_cast %300 : vector<8x8xf32> to vector<1x1x8x8xf32>
      tpu.vector_store %arg18[%c1_236, %c2_237, %c0_238, %c0_239], %444 {strides = array<i32>} : memref<2x4x8x8xf32, #tpu.memory_space<vmem>>, vector<1x1x8x8xf32>,
      %c1_240 = arith.constant 1 : index
      %c3_241 = arith.constant 3 : index
      %c0_242 = arith.constant 0 : index
      %c0_243 = arith.constant 0 : index
      %445 = vector.load %arg18[%c1_240, %c3_241, %c0_242, %c0_243] : memref<2x4x8x8xf32, #tpu.memory_space<vmem>>, vector<1x1x8x8xf32>
      %446 = vector.shape_cast %445 : vector<1x1x8x8xf32> to vector<8x8xf32>
      %447 = vector.shape_cast %325 : vector<8x8xf32> to vector<1x1x8x8xf32>
      tpu.vector_store %arg18[%c1_240, %c3_241, %c0_242, %c0_243], %447 {strides = array<i32>} : memref<2x4x8x8xf32, #tpu.memory_space<vmem>>, vector<1x1x8x8xf32>,
    } else {
    }
    return
  }
  func.func @transform_0(%arg0: i32, %arg1: i32) -> (i32, i32, i32) {
    %c0_i32 = arith.constant 0 : i32
    %c0_i32_0 = arith.constant 0 : i32
    %c0_i32_1 = arith.constant 0 : i32
    return %arg0, %c0_i32, %c0_i32_0 : i32, i32, i32
  }
  func.func @transform_1(%arg0: i32, %arg1: i32) -> (i32, i32, i32) {
    %c0_i32 = arith.constant 0 : i32
    %c0_i32_0 = arith.constant 0 : i32
    %c0_i32_1 = arith.constant 0 : i32
    return %arg1, %c0_i32, %c0_i32_0 : i32, i32, i32
  }
  func.func @transform_2(%arg0: i32, %arg1: i32) -> (i32, i32, i32) {
    %c0_i32 = arith.constant 0 : i32
    %c0_i32_0 = arith.constant 0 : i32
    %c0_i32_1 = arith.constant 0 : i32
    return %arg1, %c0_i32, %c0_i32_0 : i32, i32, i32
  }
  func.func @transform_3(%arg0: i32, %arg1: i32) -> (i32, i32, i32) {
    %c0_i32 = arith.constant 0 : i32
    %c0_i32_0 = arith.constant 0 : i32
    %c0_i32_1 = arith.constant 0 : i32
    return %arg1, %c0_i32, %c0_i32_0 : i32, i32, i32
  }
  func.func @transform_4(%arg0: i32, %arg1: i32) -> (i32, i32, i32) {
    %c0_i32 = arith.constant 0 : i32
    %c0_i32_0 = arith.constant 0 : i32
    %c0_i32_1 = arith.constant 0 : i32
    return %arg1, %c0_i32, %c0_i32_0 : i32, i32, i32
  }
  func.func @transform_5(%arg0: i32, %arg1: i32) -> (i32, i32, i32) {
    %c0_i32 = arith.constant 0 : i32
    %c0_i32_0 = arith.constant 0 : i32
    %c0_i32_1 = arith.constant 0 : i32
    return %arg1, %c0_i32, %c0_i32_0 : i32, i32, i32
  }
  func.func @transform_6(%arg0: i32, %arg1: i32) -> (i32, i32, i32) {
    %c0_i32 = arith.constant 0 : i32
    %c0_i32_0 = arith.constant 0 : i32
    %c0_i32_1 = arith.constant 0 : i32
    return %arg1, %c0_i32, %c0_i32_0 : i32, i32, i32
  }
  func.func @transform_7(%arg0: i32, %arg1: i32) -> (i32, i32, i32) {
    %c0_i32 = arith.constant 0 : i32
    %c0_i32_0 = arith.constant 0 : i32
    %c0_i32_1 = arith.constant 0 : i32
    return %arg1, %c0_i32, %c0_i32_0 : i32, i32, i32
  }
  func.func @transform_8(%arg0: i32, %arg1: i32) -> (i32, i32, i32) {
    %c0_i32 = arith.constant 0 : i32
    %c0_i32_0 = arith.constant 0 : i32
    %c0_i32_1 = arith.constant 0 : i32
    return %arg1, %c0_i32, %c0_i32_0 : i32, i32, i32
  }
  func.func @transform_9(%arg0: i32, %arg1: i32) -> (i32, i32, i32) {
    %c0_i32 = arith.constant 0 : i32
    %c0_i32_0 = arith.constant 0 : i32
    %c0_i32_1 = arith.constant 0 : i32
    return %arg1, %c0_i32, %c0_i32_0 : i32, i32, i32
  }
  func.func @transform_10(%arg0: i32, %arg1: i32) -> (i32, i32, i32) {
    %c0_i32 = arith.constant 0 : i32
    %c0_i32_0 = arith.constant 0 : i32
    %c0_i32_1 = arith.constant 0 : i32
    return %arg1, %c0_i32, %c0_i32_0 : i32, i32, i32
  }
  func.func @transform_11(%arg0: i32, %arg1: i32) -> (i32, i32, i32) {
    %c0_i32 = arith.constant 0 : i32
    %c0_i32_0 = arith.constant 0 : i32
    %c0_i32_1 = arith.constant 0 : i32
    return %arg1, %c0_i32, %c0_i32_0 : i32, i32, i32
  }
  func.func @transform_12(%arg0: i32, %arg1: i32) -> (i32, i32, i32) {
    %c0_i32 = arith.constant 0 : i32
    %c0_i32_0 = arith.constant 0 : i32
    %c0_i32_1 = arith.constant 0 : i32
    return %arg1, %c0_i32, %c0_i32_0 : i32, i32, i32
  }
  func.func @transform_13(%arg0: i32, %arg1: i32) -> (i32, i32) {
    %c0_i32 = arith.constant 0 : i32
    %c0_i32_0 = arith.constant 0 : i32
    %c0_i32_1 = arith.constant 0 : i32
    return %c0_i32, %c0_i32_0 : i32, i32
  }
  func.func @transform_14(%arg0: i32, %arg1: i32) -> (i32, i32) {
    %c0_i32 = arith.constant 0 : i32
    %c0_i32_0 = arith.constant 0 : i32
    %c0_i32_1 = arith.constant 0 : i32
    return %c0_i32, %c0_i32_0 : i32, i32
  }
  func.func @transform_15(%arg0: i32, %arg1: i32) -> (i32, i32, i32) {
    %c0_i32 = arith.constant 0 : i32
    %c0_i32_0 = arith.constant 0 : i32
    %c0_i32_1 = arith.constant 0 : i32
    return %arg0, %c0_i32, %c0_i32_0 : i32, i32, i32
  }
  func.func @transform_16(%arg0: i32, %arg1: i32) -> (i32, i32, i32, i32) {
    %c0_i32 = arith.constant 0 : i32
    %c0_i32_0 = arith.constant 0 : i32
    %c0_i32_1 = arith.constant 0 : i32
    %c0_i32_2 = arith.constant 0 : i32
    return %arg0, %c0_i32, %c0_i32_0, %c0_i32_1 : i32, i32, i32, i32
  }
}

</mosaic_0001>

<bundles_post_ra>
// kernel: tpu_custom_call.1
= control target key start
LH: loop header
LB: loop body
LE: loop exit
PB: predicated region body
PF: predicated region fallthrough
CT: control target
= control target key end

     0   :  { %s4801_s0 = inlined_call_operand.hbm [shape: f32[2,8,32], index: 0, kind: input, shape index: {}]   ;;  %s4802_s1 = inlined_call_operand.hbm [shape: f32[2,1,32], index: 1, kind: input, shape index: {}]   ;;  %s4803_s2 = inlined_call_operand.vmem [shape: f32[2,1,32], index: 2, kind: input, shape index: {}]   ;;  %s4804_s3 = inlined_call_operand.vmem [shape: bf16[2,32,96], index: 3, kind: input, shape index: {}]   ;;  %s4805_s4 = inlined_call_operand.vmem [shape: f32[2,1,96], index: 4, kind: input, shape index: {}]   ;;  %s4806_s5 = inlined_call_operand.vmem [shape: bf16[2,32,32], index: 5, kind: input, shape index: {}]   ;;  %s4807_s6 = inlined_call_operand.vmem [shape: f32[2,1,32], index: 6, kind: input, shape index: {}]   ;;  %s4808_s7 = inlined_call_operand.vmem [shape: f32[2,1,32], index: 7, kind: input, shape index: {}]   ;;  %s4809_s8 = inlined_call_operand.vmem [shape: f32[2,1,32], index: 8, kind: input, shape index: {}]   ;;  %s4810_s9 = inlined_call_operand.vmem [shape: bf16[2,32,64], index: 9, kind: input, shape index: {}]   ;;  %s4811_s10 = inlined_call_operand.vmem [shape: f32[2,1,64], index: 10, kind: input, shape index: {}]   ;;  %s4812_s11 = inlined_call_operand.vmem [shape: bf16[2,64,32], index: 11, kind: input, shape index: {}]   ;;  %s4813_s12 = inlined_call_operand.vmem [shape: f32[2,1,32], index: 12, kind: input, shape index: {}]   ;;  %s4814_s13 = inlined_call_operand.vmem [shape: f32[1,32], index: 13, kind: input, shape index: {}]   ;;  %s4815_s14 = inlined_call_operand.vmem [shape: f32[1,32], index: 14, kind: input, shape index: {}]   ;;  %s4816_s15 = inlined_call_operand.hbm [shape: f32[2,8,32], index: 15, kind: output, shape index: {0}]   ;;  %s4817_s16 = inlined_call_operand.hbm [shape: f32[2,4,8,8], index: 16, kind: output, shape index: {1}]  }
   0x1   :  { %4824 = sst [smem:[#allocation21_spill]] %s4801_s0 }
   0x2   :  { %4825 = sst [smem:[#allocation22_spill]] %s4802_s1 }
   0x3   :  { %4826 = sst [smem:[#allocation23_spill]] %s4804_s3 }
   0x4   :  { %4827 = sst [smem:[#allocation24_spill]] %s4806_s5 }
   0x5   :  { %4828 = sst [smem:[#allocation25_spill]] %s4811_s10 }
   0x6   :  { %4829 = sst [smem:[#allocation26_spill]] %s4812_s11 }
   0x7   :  { %4830 = sst [smem:[#allocation27_spill]] %s4813_s12 }
   0x8   :  { %4831 = sst [smem:[#allocation28_spill]] %s4814_s13 }
   0x9   :  { %4832 = sst [smem:[#allocation29_spill]] %s4815_s14 }
   0xa   :  { %4833 = sst [smem:[#allocation30_spill]] %s4816_s15 }
   0xb   :  { %4834 = sst [smem:[#allocation31_spill]] %s4817_s16 }
   0xc   :  { %22 = vsyncpa [#allocation4], 0 }
   0xd   :  { %23 = vsyncpa [#allocation7], 0 }
   0xe   :  { %25 = vsyncpa [#allocation7 + $0x1], 0 }
   0xf   :  { %26 = vsyncpa [#allocation5], 0 }
  0x10   :  { %27 = vsyncpa [#allocation10], 0  ;;  %s4055_s21 = smov 0   ;;  %s4057_s22 = smov 0  }
  0x11   :  { %s4059_s23 = smov 0   ;;  %s4061_s24 = smov 0  }
  0x12   :  { %s4063_s25 = smov 0   ;;  %s4065_s26 = smov 0  }
  0x13 LB: > { %4835 = sst [smem:[#allocation15_spill]] %s3931_s22  ;;  %s4818_s27 = sadd.s32 4294967295, %s3947_s26   ;;  %s3947_s26 = sphi %s4065_s26, %s33_s26   ;;  %s3943_s25 = sphi %s4063_s25, %s4871_s25   ;;  %s3939_s24 = sphi %s4061_s24, %s4870_s24   ;;  %s3935_s23 = sphi %s4059_s23, %s4869_s23   ;;  %s3931_s22 = sphi %s4057_s22, %s4868_s22   ;;  %s3927_s21 = sphi %s4055_s21, %s4867_s21  }
  0x14   : > { %4836 = sst [smem:[#allocation16_spill]] %s3935_s23  ;;  %p91_p0 = scmp.ne.s32.totalorder %s3931_s22, %s3927_s21 }
  0x15   : > { %4837 = sst [smem:[#allocation17_spill]] %s3943_s25  ;;  %p4087_p1 = scmp.eq.s32.totalorder %s4818_s27, 0 }
  0x16   : > { %4838 = sst [smem:[#allocation18_spill]] %s3947_s26  ;;  %p3197_p2 = scmp.ge.s32.totalorder %s3947_s26, 1 }
  0x17   : > { %p482_p3 = scmp.lt.s32.totalorder %s3947_s26, 3  ;;  %p4095_p4 = por %p4087_p1, %p91_p0 }
  0x18   : > { %s3949_s0 = smov [#allocation3]   ;;  %s42_s19 = sadd.s32 1, %s3943_s25 }
  0x19   : > { %p4099_p5 = pnand %p3197_p2, %p482_p3  ;;  %s497_s17 = sshll.u32 %s3949_s0, 4  ;;  %s498_s17 = int_to_ptr.vmem [resolvable:$true] %s497_s17 }
  0x1a   : > { %s3794_s20 = scalar_lea.vmem %s498_s17, 256  ;;  %p3802_p12 = scmp.lt.s32.totalorder %s498_s17, %s498_s17 }
  0x1b   : > { %p3646_p6 = pneg %p4099_p5  ;;  %p3795_p9 = scmp.ne.s32.totalorder %s498_s17, %s3794_s20 }
  0x1c   : > { %p3803_p13 = scmp.lt.s32.totalorder %s3794_s20, %s3794_s20 }
  0x1d   : > { %p4107_p7 = pnand %p3646_p6, %p4087_p1 }
  0x1e   : > { %p3804_p0 = por %p3803_p13, %p3802_p12 }
  0x1f   : > { %p3785_p8 = pneg %p4107_p7 }
  0x21   : > { %p3797_p10 = pnand %p3795_p9, %p3785_p8 }
  0x23   : > { %p3798_p11 = pneg %p3797_p10 }
  0x25   : > { %p3805_p2 = pnand %p3804_p0, %p3798_p11 }
  0x27   : > { %3808 = shalt.err (!%p3805_p2)
}
  0x28   : > { %s3950_s21 = smov 128   ;;  %s3951_s0 = smov 8  }
  0x29   : > { %s4843_s15 = sld [smem:[#allocation21_spill]]  ;;  %p43_p3 = scmp.ge.s32.totalorder %s42_s19, 2 }
  0x2a   : > { %s78_s20 = sadd.s32 1, %s3935_s23  ;;  %p85_p6 = scmp.ne.s32.totalorder %s3935_s23, %s3931_s22 }
  0x2b   : > { %p86_p8 = scmp.eq.s32.totalorder %s3947_s26, 0  ;;  %s4873_s19 = smov (%p43_p3, %s42_s19), 0 }
  0x2c   : > { %4844 = sst [smem:[#allocation19_spill]] %s4873_s19  ;;  %p3655_p10 = scmp.lt.s32.totalorder %s3947_s26, 2 }
  0x2d   : > { %p87_p9 = por %p86_p8, %p85_p6  ;;  %s75_s14 = ssub.s32 %s3943_s25, %s4873_s19 }
  0x2e   : > { %s517_s13 = sand.u32 1, %s3935_s23   ;;  %p76_p11 = scmp.eq.s32.totalorder %s75_s14, 0 }
  0x2f   : > { %3649 = dma.hbm_to_vmem [thread:$0]  (!%p4107_p7), %s4843_s15, 256, %s498_s17, [#allocation4], %s3950_s21, %s3950_s21, %s3951_s0  }
  0x30   : > { %s3200_s11 = sshll.u32 %s3943_s25, 4  ;;  %s4846_s1 = sld [smem:[#allocation22_spill]] }
  0x31   : > { %s4131_s12 = scalar_select %p76_p11, %s3935_s23, %s78_s20  }
  0x32   : > { %s520_s15 = scalar_lea.vmem [#allocation6], %s517_s13  ;;  %p4136_p7 = pnand %p3655_p10, %p87_p9 }
  0x33   : > { %4845 = sst [smem:[#allocation20_spill]] %s4131_s12  ;;  %s527_s27 = sshll.u32 %s520_s15, 4  ;;  %s528_s27 = int_to_ptr.vmem [resolvable:$true] %s527_s27 }
  0x34   : > { %s518_s21 = scalar_lea.sflag [#allocation7], %s517_s13  ;;  %p3811_p12 = pneg %p4136_p7 }
  0x35   : > { %s3822_s0 = scalar_lea.vmem %s528_s27, 16  ;;  %s3952_s14 = smov [#allocation6]  }
  0x36   : > { %s525_s16 = scalar_lea.hbm %s4846_s1, %s3200_s11  ;;  %p3823_p13 = scmp.ne.s32.totalorder %s528_s27, %s3822_s0 }
  0x37   : > { %s3827_s20 = sshll.u32 %s3952_s14, 4  ;;  %s3828_s20 = int_to_ptr.vmem [resolvable:$false] %s3827_s20 }
  0x38   : > { %p3825_p0 = pnand %p3823_p13, %p3811_p12  ;;  %s3829_s10 = scalar_lea.vmem %s3828_s20, 32 }
  0x39   : > { %p3830_p3 = scmp.lt.s32.totalorder %s528_s27, %s3828_s20  ;;  %p3831_p6 = scmp.lt.s32.totalorder %s3829_s10, %s3822_s0 }
  0x3a   : > { %p3826_p2 = pneg %p3825_p0 }
  0x3b   : > { %p3832_p8 = por %p3831_p6, %p3830_p3 }
  0x3d   : > { %p3833_p11 = pnand %p3832_p8, %p3826_p2 }
  0x3f   : > { %3836 = shalt.err (!%p3833_p11)
}
  0x40   : > { %3653 = dma.hbm_to_vmem [thread:$0]  (!%p4136_p7), %s525_s16, 16, %s528_s27, %s518_s21  }
  0x41   : > { %610 = sbr.rel (%p4099_p5) target bundleno = 5631 (0x15ff), region = 80 }
  0x46   : > { %3910 = dma.done.wait (%p4087_p1), [#allocation4], 256  }
  0x47   : > { %3912 = vsyncadd (%p4087_p1), [#allocation4], 4294967040  ;;  %s616_s11 = sand.u32 1, %s3931_s22  }
  0x48   : > { %s617_s13 = scalar_lea.sflag [#allocation7], %s616_s11  ;;  %s4151_s18 = scalar_lea.vmem [#allocation6], %s616_s11 }
  0x49   : > { %3914 = dma.done.wait (%p4095_p4), %s617_s13, 16  }
  0x4a   : > { %3916 = vsyncadd (%p4095_p4), %s617_s13, 4294967280  ;;  %p704_p5 = scmp.lt.s32.totalorder %s3939_s24, 1  ;;  %s4848_s3 = sld [smem:[#allocation23_spill]] }
  0x4b   : > { %s4849_s5 = sld [smem:[#allocation24_spill]]  ;;  %p3211_p1 = scmp.ne.s32.totalorder %s3939_s24, 0 }
  0x4c   : > { %s4159_s30 = scalar_select %p704_p5, %s3939_s24, 1 }
  0x4d   : > { %s4850_s20 = sld [smem:[#allocation25_spill]] }
  0x4e   : > { %s3276_s29 = sshll.u32 %s4159_s30, 4  ;;  %s3279_s23 = sshll.u32 %s4159_s30, 5 }
  0x4f   : > { %s4195_s14 = scalar_lea.vmem %s4810_s9, %s3276_s29  ;;  %s4851_s1 = sld [smem:[#allocation27_spill]] }
  0x50   : > { %s4169_s21 = scalar_lea.vmem %s4848_s3, %s3276_s29  ;;  %s728_s3 = scalar_lea.vmem %s4809_s8, %s4159_s30 }
  0x51   : > { %s4178_s13 = scalar_lea.vmem %s4849_s5, %s3276_s29  ;;  %s4852_s25 = sld [smem:[#allocation26_spill]] }
  0x53   : > { %s736_s5 = scalar_lea.vmem %s4850_s20, %s4159_s30  ;;  %751 = sbr.rel (%p3211_p1) target bundleno = 90 (0x5a), region = 92 }
  0x55   : > { %s744_s22 = scalar_lea.vmem %s4851_s1, %s4159_s30 }
  0x57   : > { %s4209_s26 = scalar_lea.vmem %s4852_s25, %s3279_s23 }
  0x58   : > { %v752_v0 = vld [vmem:[#allocation3] sm:$0xff]  ;;  %vm753_vm0 = vcmask 261120   ;;  %v756_v1 = vld [vmem:[#allocation3 + $0x8] sm:$0xff] }
  0x59   : > { %754 = vst.msk [vmem:[#allocation2] sm:$0xff] %vm753_vm0, %v752_v0  ;;  %757 = vst.msk [vmem:[#allocation2 + $0x8] sm:$0xff] %vm753_vm0, %v756_v1 }
  0x5a PF: > { %vm762_vm1 = vcmask 261120   ;;  %v4215_v6 = vld [vmem:[%s4169_s21 + $0x8] sm:$0xff]   ;;  %s3953_s1 = smov 96   ;;  %s3954_s12 = smov 88   ;;  %v4230_v7 = vld [vmem:[%s4169_s21] sm:$0xff]   ;;  %v3961_v20 = vmov 0.0  }
  0x5b   : > { %s3955_s23 = smov 120   ;;  %s3956_s25 = smov 112   ;;  %3372 = vmatprep.subr.bf16.mxu0 %v3961_v20  ;;  %3380 = vmatprep.subr.bf16.mxu1 %v3961_v20  ;;  %vm3962_vm2 = vmmov 0   ;;  %v3212_v35 = vld [vmem:[%s4151_s18] ss:$0 sm:$0xff]  ;;  %vm1426_vm3 = vcmask 64512  }
  0x5c   : > { %s3957_s29 = smov 48   ;;  %s3958_s20 = smov 72   ;;  %3373 = vmatpush3.bf16.msra.mxu0 %v4215_v6  ;;  %3376 = vmatprep.mubr.msk.bf16.mxu0 %vm3962_vm2, %v3961_v20  ;;  %vm1490_vm4 = vcmask 1043456   ;;  %vm2847_vm5 = vcmask 523264  }
  0x5d   : > { %s4853_s0 = scalar_lea.vmem %s4805_s4, %s4159_s30  ;;  %s3959_s10 = smov 56   ;;  %3374 = vmatprep.subr.bf16.mxu0 %v3961_v20  ;;  %3384 = vmatprep.mubr.msk.bf16.mxu1 %vm3962_vm2, %v3961_v20 }
  0x5e   : > { %v4239_v8 = vld [vmem:[%s4853_s0] ss:$0 sm:$0xff]  ;;  %s3960_s21 = smov 64   ;;  %s4854_s28 = scalar_lea.vmem %s4803_s2, %s4159_s30 }
  0x5f   : > { %v3213_v41 = vld [vmem:[%s4854_s28] ss:$0 sm:$0xff]  ;;  %s3963_s18 = smov 80   ;;  %s3964_s19 = smov 104  }
  0x60   : > { %v758_v2 = vld [vmem:[#allocation2] sm:$0xff]  ;;  %v759_v3 = vld [vmem:[#allocation2 + $0x8] sm:$0xff]  ;;  %3375 = vmatpush3.bf16.msra.mxu0 %v4230_v7  ;;  %s3965_s15 = smov 40   ;;  %p3267_p4 = scmp.ne.s32.totalorder %s3939_s24, 1 }
  0x61   : > { %v763_v4 = vsel %vm762_vm1, %v758_v2, 0.0  ;;  %v766_v5 = vsel %vm762_vm1, %v759_v3, 0.0  ;;  %3388 = vmatprep.subr.bf16.mxu0 %v3961_v20  ;;  %s4859_s24 = sld [smem:[#allocation28_spill]] (!%p3267_p4) }
  0x62   : > { %764 = vadd.xlane.f32.xlu0 %v763_v4  ;;  %s4860_s11 = sld [smem:[#allocation29_spill]] (!%p3267_p4) }
  0x66   : > { %767 = vadd.xlane.f32.xlu0 %v766_v5 }
  0x7c   : > { %876 = vrot.lane.b32.xlu0 %v4215_v6, %s3953_s1 }
  0x80   : > { %1026 = vrot.lane.b32.xlu0 %v4215_v6, %s3954_s12 }
  0x84   : > { %976 = vrot.lane.b32.xlu0 %v4215_v6, %s3955_s23 }
  0x88   : > { %1126 = vrot.lane.b32.xlu0 %v4215_v6, %s3956_s25 }
  0x8c   : > { %1226 = vrot.lane.b32.xlu0 %v4215_v6, %s3957_s29 }
  0x90   : > { %1326 = vrot.lane.b32.xlu0 %v4215_v6, %s3958_s20 }
  0x94   : > { %1324 = vrot.lane.b32.xlu0 %v4230_v7, %s3958_s20 }
  0x98   : > { %980 = vrot.lane.b32.xlu0 %v4239_v8, %s3955_s23 }
  0x9c   : > { %1074 = vrot.lane.b32.xlu0 %v4230_v7, %s3959_s10 }
  0xeb   : > { %v765_v9 = vpop.xlane.xlu0 %764 }
  0xec   : > { %v770_v10 = vmul.f32 0.03125, %v765_v9 }
  0xee   : > { %v772_v11 = vsub.f32 %v758_v2, %v770_v10 }
  0xef   : > { %v768_v12 = vpop.xlane.xlu0 %767 }
  0xf0   : > { %v771_v13 = vmul.f32 0.03125, %v768_v12  ;;  %v774_v14 = vmul.f32 %v772_v11, %v772_v11 }
  0xf2   : > { %v773_v15 = vsub.f32 %v759_v3, %v771_v13  ;;  %v776_v16 = vsel %vm762_vm1, %v774_v14, 0.0 }
  0xf3   : > { %777 = vadd.xlane.f32.xlu1 %v776_v16  ;;  %v877_v19 = vpop.permute.xlu0 %876 }
  0xf4   : > { %v775_v17 = vmul.f32 %v773_v15, %v773_v15  ;;  %3381 = vmatpush3.bf16.msra.mxu1 %v877_v19 }
  0xf5   : > { %3382 = vmatprep.subr.bf16.mxu1 %v3961_v20 }
  0xf6   : > { %v779_v18 = vsel %vm762_vm1, %v775_v17, 0.0 }
  0xf7   : > { %780 = vadd.xlane.f32.xlu1 %v779_v18  ;;  %v1027_v25 = vpop.permute.xlu0 %1026 }
  0xfb   : > { %v977_v29 = vpop.permute.xlu0 %976 }
  0xff   : > { %v1127_v32 = vpop.permute.xlu0 %1126 }
 0x103   : > { %v1227_v38 = vpop.permute.xlu0 %1226 }
 0x107   : > { %v1327_v47 = vpop.permute.xlu0 %1326 }
 0x108   : > { %926 = vrot.lane.b32.xlu1 %v4215_v6, %s3960_s21 }
 0x10b   : > { %v1325_v50 = vpop.permute.xlu0 %1324 }
 0x10c   : > { %874 = vrot.lane.b32.xlu1 %v4230_v7, %s3953_s1 }
 0x10f   : > { %v4307_v53 = vpop.permute.xlu0 %980 }
 0x110   : > { %924 = vrot.lane.b32.xlu1 %v4230_v7, %s3960_s21 }
 0x113   : > { %v1075_v55 = vpop.permute.xlu0 %1074 }
 0x114   : > { %1024 = vrot.lane.b32.xlu1 %v4230_v7, %s3954_s12 }
 0x118   : > { %974 = vrot.lane.b32.xlu1 %v4230_v7, %s3955_s23  ;;  %s4855_s23 = scalar_lea.vmem %s4807_s6, %s4159_s30 }
 0x11c   : > { %1124 = vrot.lane.b32.xlu1 %v4230_v7, %s3956_s25 }
 0x120   : > { %1224 = vrot.lane.b32.xlu1 %v4230_v7, %s3957_s29 }
 0x124   : > { %880 = vrot.lane.b32.xlu1 %v4239_v8, %s3953_s1 }
 0x128   : > { %1030 = vrot.lane.b32.xlu1 %v4239_v8, %s3954_s12 }
 0x12c   : > { %1076 = vrot.lane.b32.xlu1 %v4215_v6, %s3959_s10 }
 0x17c   : > { %v778_v21 = vpop.xlane.xlu1 %777 }
 0x17d   : > { %v782_v22 = vmul.f32 0.03125, %v778_v21 }
 0x17f   : > { %v784_v23 = vadd.f32 1e-05, %v782_v22 }
 0x180   : > { %v781_v24 = vpop.xlane.xlu1 %780 }
 0x181   : > { %3737 = vrsqrt.f32 %v784_v23  ;;  %v783_v26 = vmul.f32 0.03125, %v781_v24 }
 0x183   : > { %v785_v27 = vadd.f32 1e-05, %v783_v26 }
 0x184   : > { %v927_v28 = vpop.permute.xlu1 %926 }
 0x185   : > { %3739 = vrsqrt.f32 %v785_v27 }
 0x188   : > { %v875_v30 = vpop.permute.xlu1 %874 }
 0x189   : > { %3383 = vmatpush3.bf16.msra.mxu1 %v875_v30 }
 0x18a   : > { %3396 = vmatprep.subr.bf16.mxu1 %v3961_v20 }
 0x18c   : > { %v925_v31 = vpop.permute.xlu1 %924 }
 0x18e   : > { %v3738_v33 = vpop.eup %3737 }
 0x18f   : > { %v788_v34 = vmul.f32 %v3738_v33, %v772_v11 }
 0x190   : > { %v1025_v36 = vpop.permute.xlu1 %1024 }
 0x191   : > { %v796_v39 = vmul.f32 %v3212_v35, %v788_v34 }
 0x192   : > { %v3740_v37 = vpop.eup %3739 }
 0x193   : > { %v789_v40 = vmul.f32 %v3740_v37, %v773_v15  ;;  %v804_v44 = vadd.f32 %v3213_v41, %v796_v39 }
 0x194   : > { %v975_v42 = vpop.permute.xlu1 %974 }
 0x195   : > { %v797_v43 = vmul.f32 %v3212_v35, %v789_v40 }
 0x197   : > { %v805_v45 = vadd.f32 %v3213_v41, %v797_v43 }
 0x198   : > { %v1125_v46 = vpop.permute.xlu1 %1124 }
 0x199   : > { %v4285_v48 = vpack.c.bf16 %v805_v45, %v804_v44 }
 0x19b   : > { %3377 = vmatmul.mubr.msk.bf16.vlgmr.msra.gmra.mxu0 %vm762_vm1, %v4285_v48  ;;  %3385 = vmatmul.mubr.msk.bf16.vlgmr.msra.gmra.mxu1 %vm762_vm1, %v4285_v48 }
 0x19c   : > { %3389 = vmatpush3.bf16.msra.mxu0 %v927_v28  ;;  %v1225_v49 = vpop.permute.xlu1 %1224  ;;  %3397 = vmatpush3.bf16.msra.mxu1 %v977_v29 }
 0x19d   : > { %3390 = vmatprep.subr.bf16.mxu0 %v3961_v20  ;;  %3398 = vmatprep.subr.bf16.mxu1 %v3961_v20 }
 0x19e   : > { %3392 = vmatprep.mubr.msk.bf16.mxu0 %vm3962_vm2, %v3961_v20  ;;  %3400 = vmatprep.mubr.msk.bf16.mxu1 %vm3962_vm2, %v3961_v20 }
 0x1a0   : > { %3391 = vmatpush3.bf16.msra.mxu0 %v925_v31  ;;  %v4297_v51 = vpop.permute.xlu1 %880  ;;  %3399 = vmatpush3.bf16.msra.mxu1 %v975_v42 }
 0x1a1   : > { %3404 = vmatprep.subr.bf16.mxu0 %v3961_v20  ;;  %3412 = vmatprep.subr.bf16.mxu1 %v3961_v20 }
 0x1a3   : > { %3393 = vmatmul.mubr.msk.bf16.vlgmr.msra.gmra.mxu0 %vm762_vm1, %v4285_v48  ;;  %3401 = vmatmul.mubr.msk.bf16.vlgmr.msra.gmra.mxu1 %vm762_vm1, %v4285_v48 }
 0x1a4   : > { %v4305_v52 = vpop.permute.xlu1 %1030  ;;  %3405 = vmatpush3.bf16.msra.mxu0 %v1027_v25  ;;  %3408 = vmatprep.mubr.msk.bf16.mxu0 %vm3962_vm2, %v3961_v20 }
 0x1a5   : > { %3406 = vmatprep.subr.bf16.mxu0 %v3961_v20  ;;  %3416 = vmatprep.mubr.msk.bf16.mxu1 %vm3962_vm2, %v3961_v20 }
 0x1a8   : > { %v1077_v54 = vpop.permute.xlu1 %1076  ;;  %3407 = vmatpush3.bf16.msra.mxu0 %v1025_v36 }
 0x1a9   : > { %3413 = vmatpush3.bf16.msra.mxu1 %v1077_v54  ;;  %3420 = vmatprep.subr.bf16.mxu0 %v3961_v20 }
 0x1aa   : > { %3414 = vmatprep.subr.bf16.mxu1 %v3961_v20 }
 0x1ab   : > { %3409 = vmatmul.mubr.msk.bf16.vlgmr.msra.gmra.mxu0 %vm762_vm1, %v4285_v48 }
 0x1ac   : > { %3421 = vmatpush3.bf16.msra.mxu0 %v1127_v32  ;;  %3424 = vmatprep.mubr.msk.bf16.mxu0 %vm3962_vm2, %v3961_v20 }
 0x1ad   : > { %3415 = vmatpush3.bf16.msra.mxu1 %v1075_v55  ;;  %3422 = vmatprep.subr.bf16.mxu0 %v3961_v20 }
 0x1ae   : > { %3428 = vmatprep.subr.bf16.mxu1 %v3961_v20 }
 0x1b0   : > { %3417 = vmatmul.mubr.msk.bf16.vlgmr.msra.gmra.mxu1 %vm762_vm1, %v4285_v48  ;;  %3423 = vmatpush3.bf16.msra.mxu0 %v1125_v46 }
 0x1b1   : > { %3436 = vmatprep.subr.bf16.mxu0 %v3961_v20  ;;  %3432 = vmatprep.mubr.msk.bf16.mxu1 %vm3962_vm2, %v3961_v20 }
 0x1b3   : > { %3425 = vmatmul.mubr.msk.bf16.vlgmr.msra.gmra.mxu0 %vm762_vm1, %v4285_v48 }
 0x1b4   : > { %3437 = vmatpush3.bf16.msra.mxu0 %v1227_v38  ;;  %3440 = vmatprep.mubr.msk.bf16.mxu0 %vm3962_vm2, %v3961_v20 }
 0x1b5   : > { %3438 = vmatprep.subr.bf16.mxu0 %v3961_v20 }
 0x1b8   : > { %3439 = vmatpush3.bf16.msra.mxu0 %v1225_v49 }
 0x1b9   : > { %3452 = vmatprep.subr.bf16.mxu0 %v3961_v20 }
 0x1bb   : > { %3441 = vmatmul.mubr.msk.bf16.vlgmr.msra.gmra.mxu0 %vm762_vm1, %v4285_v48 }
 0x1bc   : > { %3453 = vmatpush3.bf16.msra.mxu0 %v1327_v47  ;;  %3456 = vmatprep.mubr.msk.bf16.mxu0 %vm3962_vm2, %v3961_v20 }
 0x1bd   : > { %3454 = vmatprep.subr.bf16.mxu0 %v3961_v20 }
 0x1c0   : > { %3455 = vmatpush3.bf16.msra.mxu0 %v1325_v50 }
 0x1c1   : > { %3468 = vmatprep.subr.bf16.mxu0 %v3961_v20 }
 0x1c3   : > { %3457 = vmatmul.mubr.msk.bf16.vlgmr.msra.gmra.mxu0 %vm762_vm1, %v4285_v48 }
 0x1c4   : > { %3470 = vmatprep.mubr.msk.bf16.mxu0 %vm3962_vm2, %v3961_v20 }
 0x25b   : > { %v867_v56 = vpop.f32.mrf.mxu0  ;;  %v917_v57 = vpop.f32.mrf.mxu1 }
 0x25c   : > { %v918_v58 = vadd.f32 %v917_v57, %v4297_v51  ;;  %v868_v3 = vadd.f32 %v4239_v8, %v867_v56 }
 0x25d   : > { %v3378_v59 = vpop.f32.mrf.mxu0  ;;  %v3386_v60 = vpop.f32.mrf.mxu1 }
 0x25e   : > { %v1425_v61 = vpack.c.bf16 %v918_v58, %v918_v58  ;;  %v1424_v11 = vpack.c.bf16 %v868_v3, %v868_v3 }
 0x25f   : > { %v4344_v62 = vpop.f32.mrf.mxu0  ;;  %v4346_v63 = vpop.f32.mrf.mxu1 }
 0x260   : > { %v1431_v0 = vsel %vm1426_vm3, %v1425_v61, 0 }
 0x261   : > { %v3379_v1 = vpop.f32.mrf.mxu0  ;;  %v3387_v2 = vpop.f32.mrf.mxu1  ;;  %3469 = vmatpush3.bf16.xpose.msra.mxu0 %v1431_v0 }
 0x262   : > { %3480 = vmatprep.subr.bf16.mxu0 %v3961_v20 }
 0x263   : > { %v4351_v4 = vpop.f32.mrf.mxu0  ;;  %v1017_v5 = vpop.f32.mrf.mxu1 }
 0x264   : > { %v1018_v25 = vadd.f32 %v1017_v5, %v4307_v53 }
 0x265   : > { %v3394_v9 = vpop.f32.mrf.mxu0  ;;  %v3402_v10 = vpop.f32.mrf.mxu1 }
 0x266   : > { %v1536_v30 = vpack.c.bf16 %v1018_v25, %v1018_v25 }
 0x267   : > { %v4353_v12 = vpop.f32.mrf.mxu0  ;;  %v4355_v13 = vpop.f32.mrf.mxu1 }
 0x268   : > { %3471 = vmatmul.mubr.msk.bf16.vlgmr.msra.gmra.mxu0 %vm1426_vm3, %v1424_v11 }
 0x269   : > { %v3395_v14 = vpop.f32.mrf.mxu0  ;;  %v3403_v15 = vpop.f32.mrf.mxu1  ;;  %3482 = vmatprep.mubr.msk.bf16.mxu0 %vm3962_vm2, %v3961_v20 }
 0x26b   : > { %v1067_v16 = vpop.f32.mrf.mxu0 }
 0x26c   : > { %v1068_v17 = vadd.f32 %v1067_v16, %v4305_v52 }
 0x26d   : > { %v3410_v18 = vpop.f32.mrf.mxu0 }
 0x26e   : > { %v1537_v19 = vpack.c.bf16 %v1068_v17, %v1068_v17 }
 0x26f   : > { %v4361_v21 = vpop.f32.mrf.mxu0 }
 0x270   : > { %v1542_v22 = vsel %vm1426_vm3, %v1537_v19, 0  ;;  %v4364_v23 = vpop.f32.mrf.mxu1 }
 0x271   : > { %v3411_v24 = vpop.f32.mrf.mxu0  ;;  %3481 = vmatpush3.bf16.xpose.msra.mxu0 %v1542_v22 }
 0x272   : > { %v3418_v26 = vpop.f32.mrf.mxu1  ;;  %3492 = vmatprep.subr.bf16.mxu0 %v3961_v20 }
 0x273   : > { %v4368_v27 = vpop.f32.mrf.mxu0 }
 0x274   : > { %v4370_v28 = vpop.f32.mrf.mxu1 }
 0x275   : > { %v3426_v29 = vpop.f32.mrf.mxu0 }
 0x276   : > { %v3419_v31 = vpop.f32.mrf.mxu1 }
 0x277   : > { %v4372_v32 = vpop.f32.mrf.mxu0 }
 0x278   : > { %3483 = vmatmul.mubr.msk.bf16.vlgmr.msra.gmra.mxu0 %vm1426_vm3, %v1536_v30 }
 0x279   : > { %v3427_v33 = vpop.f32.mrf.mxu0  ;;  %3494 = vmatprep.mubr.msk.bf16.mxu0 %vm3962_vm2, %v3961_v20 }
 0x27b   : > { %v4377_v34 = vpop.f32.mrf.mxu0 }
 0x27d   : > { %v3442_v35 = vpop.f32.mrf.mxu0 }
 0x27f   : > { %v4379_v36 = vpop.f32.mrf.mxu0 }
 0x281   : > { %v3443_v37 = vpop.f32.mrf.mxu0 }
 0x282   : > { %v1534_v37 = vld [vmem:[%s4178_s13] sm:$0xf] }
 0x283   : > { %v4381_v38 = vpop.f32.mrf.mxu0 }
 0x285   : > { %v3458_v39 = vpop.f32.mrf.mxu0 }
 0x286   : > { %v1696_v39 = vsel %vm1490_vm4, %v1534_v37, 0 }
 0x287   : > { %v4383_v40 = vpop.f32.mrf.mxu0 }
 0x289   : > { %v3459_v41 = vpop.f32.mrf.mxu0 }
 0x28a   : > { %v1644_v41 = vld [vmem:[%s4178_s13 + $0x4] sm:$0xf] }
 0x328   : > { %v1467_v42 = vpop.f32.mrf.mxu0 }
 0x329   : > { %v1473_v43 = vmul.f32 0.35355338, %v1467_v42  ;;  %v1650_v42 = vsel %vm1490_vm4, %v1644_v41, 0 }
 0x32a   : > { %v3472_v44 = vpop.f32.mrf.mxu0  ;;  %3493 = vmatpush3.bf16.msra.mxu0 %v1650_v42 }
 0x32b   : > { %v1474_v45 = vsel %vm1426_vm3, %v1473_v43, -inf  ;;  %3504 = vmatprep.subr.bf16.mxu0 %v3961_v20 }
 0x32c   : > { %1475 = vmax.xlane.f32.xlu1 %v1474_v45  ;;  %v1470_v46 = vpop.f32.mrf.mxu0 }
 0x32e   : > { %v3473_v47 = vpop.f32.mrf.mxu0 }
 0x338   : > { %v1578_v49 = vpop.f32.mrf.mxu0 }
 0x339   : > { %v1584_v50 = vmul.f32 0.35355338, %v1578_v49 }
 0x33a   : > { %v3484_v54 = vpop.f32.mrf.mxu0 }
 0x33b   : > { %v1585_v55 = vsel %vm1426_vm3, %v1584_v50, -inf }
 0x33c   : > { %1586 = vmax.xlane.f32.xlu0 %v1585_v55  ;;  %v1581_v56 = vpop.f32.mrf.mxu0 }
 0x33e   : > { %v3485_v57 = vpop.f32.mrf.mxu0 }
 0x352   : > { %1176 = vrot.lane.b32.xlu0 %v4215_v6, %s3963_s18 }
 0x356   : > { %1276 = vrot.lane.b32.xlu0 %v4215_v6, %s3964_s19 }
 0x35a   : > { %1274 = vrot.lane.b32.xlu0 %v4230_v7, %s3964_s19 }
 0x35e   : > { %1376 = vrot.lane.b32.xlu0 %v4215_v6, %s3965_s15 }
 0x362   : > { %1374 = vrot.lane.b32.xlu0 %v4230_v7, %s3965_s15 }
 0x366   : > { %930 = vrot.lane.b32.xlu0 %v4239_v8, %s3960_s21 }
 0x36a   : > { %1080 = vrot.lane.b32.xlu0 %v4239_v8, %s3959_s10 }
 0x36e   : > { %1180 = vrot.lane.b32.xlu0 %v4239_v8, %s3963_s18 }
 0x372   : > { %1130 = vrot.lane.b32.xlu0 %v4239_v8, %s3956_s25  ;;  %s4856_s25 = scalar_lea.vmem %s4808_s7, %s4159_s30 }
 0x3b5   : > { %v1476_v58 = vpop.xlane.xlu1 %1475 }
 0x3b6   : > { %v1477_v59 = vsub.f32 %v1473_v43, %v1476_v58 }
 0x3b8   : > { %v1478_v60 = vmul.f32 1.442695, %v1477_v59 }
 0x3ba   : > { %3741 = vpow2.f32 %v1478_v60 }
 0x3c5   : > { %v1587_v61 = vpop.xlane.xlu0 %1586 }
 0x3c6   : > { %v1588_v2 = vsub.f32 %v1584_v50, %v1587_v61 }
 0x3c7   : > { %v3742_v6 = vpop.eup %3741 }
 0x3c8   : > { %v1480_v0 = vsel %vm1426_vm3, %v3742_v6, 0.0  ;;  %v1589_v3 = vmul.f32 1.442695, %v1588_v2 }
 0x3c9   : > { %1481 = vadd.xlane.f32.xlu1 %v1480_v0  ;;  %v1177_v1 = vpop.permute.xlu0 %1176 }
 0x3ca   : > { %3429 = vmatpush3.bf16.msra.mxu1 %v1177_v1  ;;  %3743 = vpow2.f32 %v1589_v3 }
 0x3cb   : > { %3430 = vmatprep.subr.bf16.mxu1 %v3961_v20 }
 0x3cd   : > { %v1277_v10 = vpop.permute.xlu0 %1276 }
 0x3d1   : > { %v1275_v11 = vpop.permute.xlu0 %1274 }
 0x3d5   : > { %v1377_v15 = vpop.permute.xlu0 %1376 }
 0x3d7   : > { %v3744_v5 = vpop.eup %3743 }
 0x3d8   : > { %v1591_v9 = vsel %vm1426_vm3, %v3744_v5, 0.0 }
 0x3d9   : > { %v1375_v17 = vpop.permute.xlu0 %1374 }
 0x3da   : > { %1174 = vrot.lane.b32.xlu1 %v4230_v7, %s3963_s18 }
 0x3dd   : > { %v4415_v7 = vpop.permute.xlu0 %930 }
 0x3de   : > { %v968_v18 = vadd.f32 %v4351_v4, %v4415_v7 }
 0x3e0   : > { %v1486_v19 = vpack.c.bf16 %v968_v18, %v968_v18 }
 0x3e1   : > { %v4425_v22 = vpop.permute.xlu0 %1080 }
 0x3e2   : > { %v1118_v4 = vadd.f32 %v4364_v23, %v4425_v22  ;;  %v1492_v25 = vsel %vm1490_vm4, %v1486_v19, 0 }
 0x3e4   : > { %v1597_v29 = vpack.c.bf16 %v1118_v4, %v1118_v4 }
 0x3fe   : > { %1592 = vadd.xlane.f32.xlu1 %v1591_v9 }
 0x40f   : > { %1230 = vrot.lane.b32.xlu1 %v4239_v8, %s3957_s29 }
 0x452   : > { %v1482_v14 = vpop.xlane.xlu1 %1481 }
 0x453   : > { %3745 = vrcp.f32 %v1482_v14 }
 0x456   : > { %v1175_v16 = vpop.permute.xlu1 %1174 }
 0x457   : > { %3431 = vmatpush3.bf16.msra.mxu1 %v1175_v16 }
 0x458   : > { %3444 = vmatprep.subr.bf16.mxu1 %v3961_v20 }
 0x45a   : > { %3433 = vmatmul.mubr.msk.bf16.vlgmr.msra.gmra.mxu1 %vm762_vm1, %v4285_v48 }
 0x45b   : > { %3445 = vmatpush3.bf16.msra.mxu1 %v1277_v10  ;;  %3448 = vmatprep.mubr.msk.bf16.mxu1 %vm3962_vm2, %v3961_v20 }
 0x45c   : > { %3446 = vmatprep.subr.bf16.mxu1 %v3961_v20 }
 0x45f   : > { %3447 = vmatpush3.bf16.msra.mxu1 %v1275_v11 }
 0x460   : > { %3460 = vmatprep.subr.bf16.mxu1 %v3961_v20  ;;  %v3746_v24 = vpop.eup %3745 }
 0x461   : > { %v4436_v26 = vmul.f32 %v3746_v24, %v3742_v6 }
 0x462   : > { %3449 = vmatmul.mubr.msk.bf16.vlgmr.msra.gmra.mxu1 %vm762_vm1, %v4285_v48 }
 0x463   : > { %3461 = vmatpush3.bf16.msra.mxu1 %v1377_v15  ;;  %3464 = vmatprep.mubr.msk.bf16.mxu1 %vm3962_vm2, %v3961_v20  ;;  %v1485_v30 = vpack.c.bf16 %v4436_v26, %v4436_v26 }
 0x464   : > { %3462 = vmatprep.subr.bf16.mxu1 %v3961_v20 }
 0x467   : > { %3463 = vmatpush3.bf16.msra.mxu1 %v1375_v17 }
 0x468   : > { %3474 = vmatprep.subr.bf16.mxu1 %v3961_v20 }
 0x46a   : > { %3465 = vmatmul.mubr.msk.bf16.vlgmr.msra.gmra.mxu1 %vm762_vm1, %v4285_v48  ;;  %v1602_v48 = vsel %vm1490_vm4, %v1597_v29, 0 }
 0x46b   : > { %3475 = vmatpush3.bf16.msra.mxu1 %v1492_v25  ;;  %3476 = vmatprep.mubr.msk.bf16.mxu1 %vm3962_vm2, %v3961_v20 }
 0x46c   : > { %3486 = vmatprep.subr.bf16.mxu1 %v3961_v20 }
 0x472   : > { %3477 = vmatmul.mubr.msk.bf16.vlgmr.msra.gmra.mxu1 %vm1426_vm3, %v1485_v30 }
 0x473   : > { %3487 = vmatpush3.bf16.msra.mxu1 %v1602_v48  ;;  %3488 = vmatprep.mubr.msk.bf16.mxu1 %vm3962_vm2, %v3961_v20 }
 0x474   : > { %3498 = vmatprep.subr.bf16.mxu1 %v3961_v20 }
 0x487   : > { %v1593_v23 = vpop.xlane.xlu1 %1592 }
 0x488   : > { %3747 = vrcp.f32 %v1593_v23 }
 0x48b   : > { %v4464_v55 = vpop.permute.xlu1 %1230 }
 0x48c   : > { %v1268_v58 = vadd.f32 %v4377_v34, %v4464_v55  ;;  %v4477_v34 = vpop.permute.xlu0 %1180 }
 0x48e   : > { %v1799_v61 = vpack.c.bf16 %v1268_v58, %v1268_v58 }
 0x490   : > { %v1804_v2 = vsel %vm1490_vm4, %v1799_v61, 0  ;;  %v4480_v15 = vpop.permute.xlu0 %1130 }
 0x491   : > { %v1168_v19 = vadd.f32 %v4368_v27, %v4480_v15 }
 0x493   : > { %v1738_v4 = vpack.c.bf16 %v1168_v19, %v1168_v19 }
 0x495   : > { %v3748_v31 = vpop.eup %3747 }
 0x496   : > { %v4445_v33 = vmul.f32 %v3748_v31, %v3744_v5 }
 0x498   : > { %v1596_v35 = vpack.c.bf16 %v4445_v33, %v4445_v33 }
 0x49a   : > { %3489 = vmatmul.mubr.msk.bf16.vlgmr.msra.gmra.mxu1 %vm1426_vm3, %v1596_v35 }
 0x49b   : > { %3500 = vmatprep.mubr.msk.bf16.mxu1 %vm3962_vm2, %v3961_v20  ;;  %3499 = vmatpush3.bf16.msra.mxu1 %v1696_v39 }
 0x49c   : > { %3510 = vmatprep.subr.bf16.mxu1 %v3961_v20 }
 0x51a   : > { %v1217_v43 = vpop.f32.mrf.mxu1 }
 0x51b   : > { %v1218_v9 = vadd.f32 %v1217_v43, %v4477_v34 }
 0x51c   : > { %v3434_v44 = vpop.f32.mrf.mxu1 }
 0x51d   : > { %v1739_v10 = vpack.c.bf16 %v1218_v9, %v1218_v9 }
 0x51e   : > { %v4458_v45 = vpop.f32.mrf.mxu1 }
 0x51f   : > { %v1744_v17 = vsel %vm1426_vm3, %v1739_v10, 0 }
 0x520   : > { %v3435_v46 = vpop.f32.mrf.mxu1 }
 0x522   : > { %v4460_v47 = vpop.f32.mrf.mxu1 }
 0x524   : > { %v3450_v49 = vpop.f32.mrf.mxu1 }
 0x526   : > { %v4462_v50 = vpop.f32.mrf.mxu1 }
 0x528   : > { %v3451_v54 = vpop.f32.mrf.mxu1 }
 0x52a   : > { %v4466_v56 = vpop.f32.mrf.mxu1 }
 0x52c   : > { %v3466_v57 = vpop.f32.mrf.mxu1 }
 0x52e   : > { %v4470_v59 = vpop.f32.mrf.mxu1 }
 0x530   : > { %v3467_v60 = vpop.f32.mrf.mxu1 }
 0x532   : > { %v1528_v6 = vpop.f32.mrf.mxu1 }
 0x533   : > { %v1535_v0 = vpack.c.bf16 %v1528_v6, %v1528_v6 }
 0x534   : > { %v3478_v1 = vpop.f32.mrf.mxu1 }
 0x535   : > { %3501 = vmatmul.mubr.msk.bf16.vlgmr.msra.gmra.mxu1 %vm1426_vm3, %v1535_v0 }
 0x536   : > { %3511 = vmatpush3.bf16.msra.mxu1 %v1804_v2  ;;  %v1531_v3 = vpop.f32.mrf.mxu1  ;;  %3512 = vmatprep.mubr.msk.bf16.mxu1 %vm3962_vm2, %v3961_v20 }
 0x537   : > { %3522 = vmatprep.subr.bf16.mxu1 %v3961_v20 }
 0x538   : > { %v3479_v5 = vpop.f32.mrf.mxu1 }
 0x55a   : > { %v1638_v11 = vpop.f32.mrf.mxu1 }
 0x55b   : > { %v1645_v14 = vpack.c.bf16 %v1638_v11, %v1638_v11 }
 0x55c   : > { %v3490_v16 = vpop.f32.mrf.mxu1 }
 0x55d   : > { %3495 = vmatmul.mubr.msk.bf16.vlgmr.msra.gmra.mxu0 %vm1426_vm3, %v1645_v14  ;;  %v1846_v14 = vld [vmem:[%s4178_s13 + $0x8] sm:$0xf] }
 0x55e   : > { %3505 = vmatpush3.bf16.xpose.msra.mxu0 %v1744_v17  ;;  %v1641_v18 = vpop.f32.mrf.mxu1  ;;  %3506 = vmatprep.mubr.msk.bf16.mxu0 %vm3962_vm2, %v3961_v20  ;;  %v1852_v16 = vsel %vm1490_vm4, %v1846_v14, 0 }
 0x55f   : > { %3516 = vmatprep.subr.bf16.mxu0 %v3961_v20 }
 0x560   : > { %v3491_v24 = vpop.f32.mrf.mxu1 }
 0x565   : > { %3507 = vmatmul.mubr.msk.bf16.vlgmr.msra.gmra.mxu0 %vm1426_vm3, %v1738_v4 }
 0x566   : > { %3518 = vmatprep.mubr.msk.bf16.mxu0 %vm3962_vm2, %v3961_v20  ;;  %3517 = vmatpush3.bf16.msra.mxu0 %v1852_v16 }
 0x567   : > { %3528 = vmatprep.subr.bf16.mxu0 %v3961_v20 }
 0x5f5   : > { %v1732_v25 = vpop.f32.mrf.mxu1 }
 0x5f7   : > { %v3502_v29 = vpop.f32.mrf.mxu1 }
 0x5f9   : > { %v1735_v30 = vpop.f32.mrf.mxu1 }
 0x5fb   : > { %v3503_v48 = vpop.f32.mrf.mxu1 }
 0x61d   : > { %v1686_v23 = vpop.f32.mrf.mxu0 }
 0x61e   : > { %v4492_v31 = vadd.f32 %v1732_v25, %v1686_v23 }
 0x61f   : > { %v3496_v35 = vpop.f32.mrf.mxu0 }
 0x621   : > { %v1689_v37 = vpop.f32.mrf.mxu0 }
 0x623   : > { %v3497_v39 = vpop.f32.mrf.mxu0 }
 0x625   : > { %v1780_v27 = vpop.f32.mrf.mxu0 }
 0x626   : > { %v1786_v41 = vmul.f32 0.35355338, %v1780_v27 }
 0x627   : > { %v3508_v42 = vpop.f32.mrf.mxu0 }
 0x628   : > { %v1787_v43 = vsel %vm1426_vm3, %v1786_v41, -inf }
 0x629   : > { %1788 = vmax.xlane.f32.xlu0 %v1787_v43  ;;  %v1783_v44 = vpop.f32.mrf.mxu0 }
 0x62b   : > { %v3509_v46 = vpop.f32.mrf.mxu0 }
 0x63f   : > { %1280 = vrot.lane.b32.xlu0 %v4239_v8, %s3964_s19 }
 0x6b2   : > { %v1789_v49 = vpop.xlane.xlu0 %1788 }
 0x6b3   : > { %v1790_v54 = vsub.f32 %v1786_v41, %v1789_v49 }
 0x6b5   : > { %v1791_v57 = vmul.f32 1.442695, %v1790_v54 }
 0x6b6   : > { %v4508_v9 = vpop.permute.xlu0 %1280 }
 0x6b7   : > { %3749 = vpow2.f32 %v1791_v57 }
 0x6c4   : > { %v3750_v58 = vpop.eup %3749 }
 0x6c5   : > { %v1793_v60 = vsel %vm1426_vm3, %v3750_v58, 0.0 }
 0x6c6   : > { %1794 = vadd.xlane.f32.xlu1 %v1793_v60 }
 0x6d7   : > { %1330 = vrot.lane.b32.xlu1 %v4239_v8, %s3958_s20 }
 0x74f   : > { %v1795_v61 = vpop.xlane.xlu1 %1794 }
 0x750   : > { %3751 = vrcp.f32 %v1795_v61  ;;  %v2003_v61 = vld [vmem:[%s4178_s13 + $0xc] sm:$0xf] }
 0x753   : > { %v4500_v6 = vpop.permute.xlu1 %1330 }
 0x754   : > { %v1368_v0 = vadd.f32 %v4381_v38, %v4500_v6  ;;  %v1318_v38 = vadd.f32 %v4460_v47, %v4508_v9 }
 0x756   : > { %v1896_v2 = vpack.c.bf16 %v1368_v0, %v1368_v0  ;;  %v1895_v11 = vpack.c.bf16 %v1318_v38, %v1318_v38 }
 0x758   : > { %v1901_v10 = vsel %vm1426_vm3, %v1896_v2, 0 }
 0x75d   : > { %v3752_v1 = vpop.eup %3751 }
 0x75e   : > { %v4504_v3 = vmul.f32 %v3752_v1, %v3750_v58  ;;  %v921_v1 = vadd.f32 %v4346_v63, %v4297_v51  ;;  %v871_v51 = vadd.f32 %v4239_v8, %v4344_v62 }
 0x760   : > { %v1798_v5 = vpack.c.bf16 %v4504_v3, %v4504_v3  ;;  %v2062_v14 = vpack.c.bf16 %v871_v51, %v871_v51 }
 0x762   : > { %3513 = vmatmul.mubr.msk.bf16.vlgmr.msra.gmra.mxu1 %vm1426_vm3, %v1798_v5  ;;  %v2063_v5 = vpack.c.bf16 %v921_v1, %v921_v1  ;;  %v4584_v1 = vld [vmem:[%s4855_s23] ss:$0 sm:$0xff] }
 0x763   : > { %3523 = vmatpush3.bf16.xpose.msra.mxu1 %v1901_v10  ;;  %3524 = vmatprep.mubr.msk.bf16.mxu1 %vm3962_vm2, %v3961_v20 }
 0x764   : > { %3534 = vmatprep.subr.bf16.mxu1 %v3961_v20  ;;  %v2068_v38 = vsel %vm1426_vm3, %v2063_v5, 0  ;;  %v3777_v5 = vld [vmem:[#allocation2] sm:$0xff] }
 0x76a   : > { %3525 = vmatmul.mubr.msk.bf16.vlgmr.msra.gmra.mxu1 %vm1426_vm3, %v1895_v11  ;;  %v1071_v11 = vadd.f32 %v4361_v21, %v4305_v52  ;;  %v1021_v52 = vadd.f32 %v4355_v13, %v4307_v53 }
 0x76b   : > { %3536 = vmatprep.mubr.msk.bf16.mxu1 %vm3962_vm2, %v3961_v20 }
 0x76c   : > { %v2173_v63 = vpack.c.bf16 %v1071_v11, %v1071_v11  ;;  %v2172_v21 = vpack.c.bf16 %v1021_v52, %v1021_v52 }
 0x76e   : > { %v2178_v16 = vsel %vm1426_vm3, %v2173_v63, 0 }
 0x822   : > { %v1840_v17 = vpop.f32.mrf.mxu1 }
 0x823   : > { %v1847_v18 = vpack.c.bf16 %v1840_v17, %v1840_v17 }
 0x824   : > { %v3514_v19 = vpop.f32.mrf.mxu1 }
 0x825   : > { %3519 = vmatmul.mubr.msk.bf16.vlgmr.msra.gmra.mxu0 %vm1426_vm3, %v1847_v18 }
 0x826   : > { %v1843_v47 = vpop.f32.mrf.mxu1  ;;  %3530 = vmatprep.mubr.msk.bf16.mxu0 %vm3962_vm2, %v3961_v20 }
 0x828   : > { %v3515_v24 = vpop.f32.mrf.mxu1 }
 0x82a   : > { %v1937_v4 = vpop.f32.mrf.mxu1 }
 0x82b   : > { %v1943_v25 = vmul.f32 0.35355338, %v1937_v4 }
 0x82c   : > { %v3526_v29 = vpop.f32.mrf.mxu1 }
 0x82d   : > { %v1944_v30 = vsel %vm1426_vm3, %v1943_v25, -inf }
 0x82e   : > { %1945 = vmax.xlane.f32.xlu1 %v1944_v30  ;;  %v1940_v48 = vpop.f32.mrf.mxu1 }
 0x830   : > { %v3527_v23 = vpop.f32.mrf.mxu1 }
 0x83f   : > { %1380 = vrot.lane.b32.xlu1 %v4239_v8, %s3965_s15  ;;  %v971_v8 = vadd.f32 %v4353_v12, %v4415_v7 }
 0x841   : > { %v2123_v62 = vpack.c.bf16 %v971_v8, %v971_v8 }
 0x843   : > { %v2128_v47 = vsel %vm1490_vm4, %v2123_v62, 0 }
 0x8b7   : > { %v1946_v35 = vpop.xlane.xlu1 %1945 }
 0x8b8   : > { %v1947_v37 = vsub.f32 %v1943_v25, %v1946_v35 }
 0x8ba   : > { %v1948_v39 = vmul.f32 1.442695, %v1947_v37 }
 0x8bb   : > { %v4529_v27 = vpop.permute.xlu1 %1380 }
 0x8bc   : > { %3753 = vpow2.f32 %v1948_v39  ;;  %v1418_v41 = vadd.f32 %v4466_v56, %v4529_v27  ;;  %v2009_v56 = vsel %vm1490_vm4, %v2003_v61, 0 }
 0x8bd   : > { %3535 = vmatpush3.bf16.msra.mxu1 %v2009_v56 }
 0x8be   : > { %v1956_v42 = vpack.c.bf16 %v1418_v41, %v1418_v41  ;;  %3546 = vmatprep.subr.bf16.mxu1 %v3961_v20 }
 0x8c0   : > { %v1961_v43 = vsel %vm1490_vm4, %v1956_v42, 0 }
 0x8c1   : > { %3529 = vmatpush3.bf16.msra.mxu0 %v1961_v43 }
 0x8c2   : > { %3540 = vmatprep.subr.bf16.mxu0 %v3961_v20 }
 0x8c9   : > { %v3754_v44 = vpop.eup %3753 }
 0x8ca   : > { %v1950_v46 = vsel %vm1426_vm3, %v3754_v44, 0.0 }
 0x8cb   : > { %1951 = vadd.xlane.f32.xlu0 %v1950_v46 }
 0x8e5   : > { %v1888_v49 = vpop.f32.mrf.mxu0 }
 0x8e6   : > { %v4537_v54 = vadd.f32 %v1888_v49, %v4492_v31 }
 0x8e7   : > { %v3520_v57 = vpop.f32.mrf.mxu0 }
 0x8e9   : > { %v1891_v58 = vpop.f32.mrf.mxu0 }
 0x8eb   : > { %v3521_v60 = vpop.f32.mrf.mxu0 }
 0x954   : > { %v1952_v0 = vpop.xlane.xlu0 %1951 }
 0x955   : > { %3755 = vrcp.f32 %v1952_v0 }
 0x962   : > { %v3756_v2 = vpop.eup %3755 }
 0x963   : > { %v4544_v10 = vmul.f32 %v3756_v2, %v3754_v44 }
 0x965   : > { %v1955_v31 = vpack.c.bf16 %v4544_v10, %v4544_v10 }
 0x967   : > { %3531 = vmatmul.mubr.msk.bf16.vlgmr.msra.gmra.mxu0 %vm1426_vm3, %v1955_v31 }
 0x968   : > { %3541 = vmatpush3.bf16.xpose.msra.mxu0 %v2068_v38  ;;  %3542 = vmatprep.mubr.msk.bf16.mxu0 %vm3962_vm2, %v3961_v20 }
 0x969   : > { %3552 = vmatprep.subr.bf16.mxu0 %v3961_v20 }
 0x96f   : > { %3543 = vmatmul.mubr.msk.bf16.vlgmr.msra.gmra.mxu0 %vm1426_vm3, %v2062_v14 }
 0x970   : > { %3553 = vmatpush3.bf16.xpose.msra.mxu0 %v2178_v16  ;;  %3554 = vmatprep.mubr.msk.bf16.mxu0 %vm3962_vm2, %v3961_v20 }
 0x971   : > { %3564 = vmatprep.subr.bf16.mxu0 %v3961_v20 }
 0x977   : > { %3555 = vmatmul.mubr.msk.bf16.vlgmr.msra.gmra.mxu0 %vm1426_vm3, %v2172_v21 }
 0x978   : > { %3566 = vmatprep.mubr.msk.bf16.mxu0 %vm3962_vm2, %v3961_v20 }
 0xa27   : > { %v1997_v17 = vpop.f32.mrf.mxu0 }
 0xa28   : > { %v2004_v18 = vpack.c.bf16 %v1997_v17, %v1997_v17 }
 0xa29   : > { %v3532_v19 = vpop.f32.mrf.mxu0 }
 0xa2a   : > { %3537 = vmatmul.mubr.msk.bf16.vlgmr.msra.gmra.mxu1 %vm1426_vm3, %v2004_v18 }
 0xa2b   : > { %3547 = vmatpush3.bf16.msra.mxu1 %v2128_v47  ;;  %v2000_v53 = vpop.f32.mrf.mxu0  ;;  %3548 = vmatprep.mubr.msk.bf16.mxu1 %vm3962_vm2, %v3961_v20  ;;  %v2280_v47 = vld [vmem:[%s4178_s13 + $0x4] sm:$0xf] }
 0xa2c   : > { %3558 = vmatprep.subr.bf16.mxu1 %v3961_v20  ;;  %v2286_v53 = vsel %vm1490_vm4, %v2280_v47, 0 }
 0xa2d   : > { %v3533_v13 = vpop.f32.mrf.mxu0  ;;  %3565 = vmatpush3.bf16.msra.mxu0 %v2286_v53 }
 0xa2e   : > { %3576 = vmatprep.subr.bf16.mxu0 %v3961_v20  ;;  %v1271_v13 = vadd.f32 %v4379_v36, %v4464_v55 }
 0xa2f   : > { %v2104_v24 = vpop.f32.mrf.mxu0 }
 0xa30   : > { %v2110_v4 = vmul.f32 0.35355338, %v2104_v24  ;;  %v2435_v24 = vpack.c.bf16 %v1271_v13, %v1271_v13 }
 0xa31   : > { %v3544_v25 = vpop.f32.mrf.mxu0 }
 0xa32   : > { %v2111_v12 = vsel %vm1426_vm3, %v2110_v4, -inf }
 0xa33   : > { %2112 = vmax.xlane.f32.xlu0 %v2111_v12  ;;  %v2107_v7 = vpop.f32.mrf.mxu0 }
 0xa34   : > { %v1221_v7 = vadd.f32 %v4458_v45, %v4477_v34  ;;  %v1171_v34 = vadd.f32 %v4372_v32, %v4480_v15 }
 0xa35   : > { %v3545_v29 = vpop.f32.mrf.mxu0 }
 0xa36   : > { %v2440_v29 = vsel %vm1490_vm4, %v2435_v24, 0  ;;  %v2375_v36 = vpack.c.bf16 %v1221_v7, %v1221_v7 }
 0xa37   : > { %v2214_v30 = vpop.f32.mrf.mxu0 }
 0xa38   : > { %v2220_v48 = vmul.f32 0.35355338, %v2214_v30 }
 0xa39   : > { %v3556_v23 = vpop.f32.mrf.mxu0 }
 0xa3a   : > { %v2221_v35 = vsel %vm1426_vm3, %v2220_v48, -inf }
 0xa3b   : > { %2222 = vmax.xlane.f32.xlu1 %v2221_v35  ;;  %v2217_v37 = vpop.f32.mrf.mxu0 }
 0xa3c   : > { %v2380_v37 = vsel %vm1426_vm3, %v2375_v36, 0 }
 0xa3d   : > { %v3557_v39 = vpop.f32.mrf.mxu0 }
 0xabc   : > { %v2113_v41 = vpop.xlane.xlu0 %2112 }
 0xabd   : > { %v2114_v42 = vsub.f32 %v2110_v4, %v2113_v41  ;;  %v2374_v41 = vpack.c.bf16 %v1171_v34, %v1171_v34 }
 0xabf   : > { %v2115_v43 = vmul.f32 1.442695, %v2114_v42 }
 0xac1   : > { %3757 = vpow2.f32 %v2115_v43 }
 0xac4   : > { %v2223_v44 = vpop.xlane.xlu1 %2222 }
 0xac5   : > { %v2224_v46 = vsub.f32 %v2220_v48, %v2223_v44 }
 0xac7   : > { %v2225_v49 = vmul.f32 1.442695, %v2224_v46 }
 0xac9   : > { %3759 = vpow2.f32 %v2225_v49 }
 0xace   : > { %v3758_v57 = vpop.eup %3757 }
 0xacf   : > { %v2117_v58 = vsel %vm1426_vm3, %v3758_v57, 0.0 }
 0xad0   : > { %2118 = vadd.xlane.f32.xlu0 %v2117_v58 }
 0xad6   : > { %v3760_v60 = vpop.eup %3759 }
 0xad7   : > { %v2227_v61 = vsel %vm1426_vm3, %v3760_v60, 0.0 }
 0xad8   : > { %2228 = vadd.xlane.f32.xlu0 %v2227_v61 }
 0xaea   : > { %v2045_v56 = vpop.f32.mrf.mxu1 }
 0xaeb   : > { %v2051_v0 = vadd.f32 %v2045_v56, %v4537_v54  ;;  %v1121_v54 = vadd.f32 %v4370_v28, %v4425_v22  ;;  %v2170_v28 = vld [vmem:[%s4178_s13] sm:$0xf] }
 0xaec   : > { %v3538_v2 = vpop.f32.mrf.mxu1  ;;  %v2332_v19 = vsel %vm1490_vm4, %v2170_v28, 0 }
 0xaed   : > { %v2052_v31 = vadd.f32 %v3777_v5, %v2051_v0  ;;  %v2233_v52 = vpack.c.bf16 %v1121_v54, %v1121_v54 }
 0xaee   : > { %v2048_v38 = vpop.f32.mrf.mxu1 }
 0xaef   : > { %v2060_v11 = vadd.f32 %v4584_v1, %v2052_v31  ;;  %v2238_v62 = vsel %vm1490_vm4, %v2233_v52, 0  ;;  %v1371_v52 = vadd.f32 %v4383_v40, %v4500_v6  ;;  %v1421_v6 = vadd.f32 %v4470_v59, %v4529_v27 }
 0xaf0   : > { %v3539_v51 = vpop.f32.mrf.mxu1 }
 0xaf1   : > { %2061 = vst.msk [vmem:[#allocation2] sm:$0xff] %vm762_vm1, %v2060_v11  ;;  %v2592_v47 = vpack.c.bf16 %v1421_v6, %v1421_v6 }
 0xb59   : > { %v2119_v63 = vpop.xlane.xlu0 %2118 }
 0xb5a   : > { %3761 = vrcp.f32 %v2119_v63 }
 0xb61   : > { %v2229_v14 = vpop.xlane.xlu0 %2228 }
 0xb62   : > { %3763 = vrcp.f32 %v2229_v14  ;;  %v2482_v14 = vld [vmem:[%s4178_s13 + $0x8] sm:$0xf] }
 0xb63   : > { %v2488_v54 = vsel %vm1490_vm4, %v2482_v14, 0 }
 0xb67   : > { %v3762_v16 = vpop.eup %3761 }
 0xb68   : > { %v4590_v21 = vmul.f32 %v3762_v16, %v3758_v57 }
 0xb6a   : > { %v2122_v8 = vpack.c.bf16 %v4590_v21, %v4590_v21 }
 0xb6c   : > { %3549 = vmatmul.mubr.msk.bf16.vlgmr.msra.gmra.mxu1 %vm1426_vm3, %v2122_v8 }
 0xb6d   : > { %3559 = vmatpush3.bf16.msra.mxu1 %v2238_v62  ;;  %3560 = vmatprep.mubr.msk.bf16.mxu1 %vm3962_vm2, %v3961_v20  ;;  %v2532_v62 = vpack.c.bf16 %v1371_v52, %v1371_v52 }
 0xb6e   : > { %3570 = vmatprep.subr.bf16.mxu1 %v3961_v20 }
 0xb6f   : > { %v3764_v17 = vpop.eup %3763 }
 0xb70   : > { %v4600_v22 = vmul.f32 %v3764_v17, %v3760_v60 }
 0xb72   : > { %v2232_v18 = vpack.c.bf16 %v4600_v22, %v4600_v22 }
 0xb74   : > { %3561 = vmatmul.mubr.msk.bf16.vlgmr.msra.gmra.mxu1 %vm1426_vm3, %v2232_v18  ;;  %v2537_v18 = vsel %vm1426_vm3, %v2532_v62, 0 }
 0xb75   : > { %3571 = vmatpush3.bf16.msra.mxu1 %v2332_v19  ;;  %3572 = vmatprep.mubr.msk.bf16.mxu1 %vm3962_vm2, %v3961_v20  ;;  %v1321_v19 = vadd.f32 %v4462_v50, %v4508_v9 }
 0xb76   : > { %3582 = vmatprep.subr.bf16.mxu1 %v3961_v20 }
 0xb77   : > { %v2531_v40 = vpack.c.bf16 %v1321_v19, %v1321_v19 }
 0xc2c   : > { %v2164_v4 = vpop.f32.mrf.mxu1 }
 0xc2d   : > { %v2171_v25 = vpack.c.bf16 %v2164_v4, %v2164_v4  ;;  %v2597_v4 = vsel %vm1490_vm4, %v2592_v47, 0  ;;  %v3731_v47 = vld [vmem:[%s4195_s14 + $0x8] sm:$0xff]  }
 0xc2e   : > { %v3550_v12 = vpop.f32.mrf.mxu1 }
 0xc2f   : > { %3573 = vmatmul.mubr.msk.bf16.vlgmr.msra.gmra.mxu1 %vm1426_vm3, %v2171_v25 }
 0xc30   : > { %3583 = vmatpush3.bf16.msra.mxu1 %v2440_v29  ;;  %v2167_v30 = vpop.f32.mrf.mxu1  ;;  %3584 = vmatprep.mubr.msk.bf16.mxu1 %vm3962_vm2, %v3961_v20 }
 0xc31   : > { %3594 = vmatprep.subr.bf16.mxu1 %v3961_v20 }
 0xc32   : > { %v3551_v48 = vpop.f32.mrf.mxu1 }
 0xc34   : > { %v2274_v55 = vpop.f32.mrf.mxu1 }
 0xc35   : > { %v2281_v23 = vpack.c.bf16 %v2274_v55, %v2274_v55 }
 0xc36   : > { %v3562_v35 = vpop.f32.mrf.mxu1 }
 0xc37   : > { %3567 = vmatmul.mubr.msk.bf16.vlgmr.msra.gmra.mxu0 %vm1426_vm3, %v2281_v23  ;;  %v4663_v35 = vld [vmem:[#allocation2] sm:$0xff] }
 0xc38   : > { %3577 = vmatpush3.bf16.xpose.msra.mxu0 %v2380_v37  ;;  %v2277_v45 = vpop.f32.mrf.mxu1  ;;  %3578 = vmatprep.mubr.msk.bf16.mxu0 %vm3962_vm2, %v3961_v20  ;;  %v2702_v37 = vsel %vm762_vm1, %v4663_v35, 0.0 }
 0xc39   : > { %3588 = vmatprep.subr.bf16.mxu0 %v3961_v20 }
 0xc3a   : > { %v3563_v39 = vpop.f32.mrf.mxu1 }
 0xc3f   : > { %3579 = vmatmul.mubr.msk.bf16.vlgmr.msra.gmra.mxu0 %vm1426_vm3, %v2374_v41  ;;  %v2639_v41 = vld [vmem:[%s4178_s13 + $0xc] sm:$0xf] }
 0xc40   : > { %3590 = vmatprep.mubr.msk.bf16.mxu0 %vm3962_vm2, %v3961_v20  ;;  %3589 = vmatpush3.bf16.msra.mxu0 %v2488_v54 }
 0xc41   : > { %3600 = vmatprep.subr.bf16.mxu0 %v3961_v20 }
 0xcef   : > { %v2368_v42 = vpop.f32.mrf.mxu1 }
 0xcf1   : > { %v3574_v43 = vpop.f32.mrf.mxu1 }
 0xcf3   : > { %v2371_v44 = vpop.f32.mrf.mxu1 }
 0xcf5   : > { %v3575_v46 = vpop.f32.mrf.mxu1 }
 0xcf7   : > { %v2322_v49 = vpop.f32.mrf.mxu0 }
 0xcf8   : > { %v4631_v57 = vadd.f32 %v2368_v42, %v2322_v49  ;;  %v2645_v42 = vsel %vm1490_vm4, %v2639_v41, 0  ;;  %v3736_v41 = vld [vmem:[%s4209_s26] sm:$0xff]  }
 0xcf9   : > { %v3568_v58 = vpop.f32.mrf.mxu0 }
 0xcfb   : > { %v2325_v60 = vpop.f32.mrf.mxu0 }
 0xcfd   : > { %v3569_v32 = vpop.f32.mrf.mxu0 }
 0xcff   : > { %v2416_v15 = vpop.f32.mrf.mxu0 }
 0xd00   : > { %v2422_v61 = vmul.f32 0.35355338, %v2416_v15 }
 0xd01   : > { %v3580_v56 = vpop.f32.mrf.mxu0 }
 0xd02   : > { %v2423_v0 = vsel %vm1426_vm3, %v2422_v61, -inf }
 0xd03   : > { %2424 = vmax.xlane.f32.xlu0 %v2423_v0  ;;  %v2419_v2 = vpop.f32.mrf.mxu0 }
 0xd05   : > { %v3581_v5 = vpop.f32.mrf.mxu0 }
 0xd8c   : > { %v2425_v31 = vpop.xlane.xlu0 %2424 }
 0xd8d   : > { %v2426_v38 = vsub.f32 %v2422_v61, %v2425_v31  ;;  %v3778_v31 = vld [vmem:[#allocation2 + $0x8] sm:$0xff] }
 0xd8f   : > { %v2427_v11 = vmul.f32 1.442695, %v2426_v38 }
 0xd91   : > { %3765 = vpow2.f32 %v2427_v11 }
 0xd9e   : > { %v3766_v51 = vpop.eup %3765 }
 0xd9f   : > { %v2429_v63 = vsel %vm1426_vm3, %v3766_v51, 0.0 }
 0xda0   : > { %2430 = vadd.xlane.f32.xlu0 %v2429_v63 }
 0xe29   : > { %v2431_v16 = vpop.xlane.xlu0 %2430 }
 0xe2a   : > { %3767 = vrcp.f32 %v2431_v16 }
 0xe37   : > { %v3768_v8 = vpop.eup %3767 }
 0xe38   : > { %v4640_v17 = vmul.f32 %v3768_v8, %v3766_v51 }
 0xe3a   : > { %v2434_v28 = vpack.c.bf16 %v4640_v17, %v4640_v17 }
 0xe3c   : > { %3585 = vmatmul.mubr.msk.bf16.vlgmr.msra.gmra.mxu1 %vm1426_vm3, %v2434_v28 }
 0xe3d   : > { %3595 = vmatpush3.bf16.xpose.msra.mxu1 %v2537_v18  ;;  %3596 = vmatprep.mubr.msk.bf16.mxu1 %vm3962_vm2, %v3961_v20 }
 0xe3e   : > { %3606 = vmatprep.subr.bf16.mxu1 %v3961_v20 }
 0xe44   : > { %3597 = vmatmul.mubr.msk.bf16.vlgmr.msra.gmra.mxu1 %vm1426_vm3, %v2531_v40 }
 0xe45   : > { %3608 = vmatprep.mubr.msk.bf16.mxu1 %vm3962_vm2, %v3961_v20  ;;  %3607 = vmatpush3.bf16.msra.mxu1 %v2645_v42  ;;  %v3257_v42 = vld [vmem:[%s736_s5] ss:$0 sm:$0xff] }
 0xe46   : > { %3620 = vmatprep.subr.bf16.mxu1 %v3961_v20 }
 0xefc   : > { %v2476_v53 = vpop.f32.mrf.mxu1 }
 0xefd   : > { %v2483_v13 = vpack.c.bf16 %v2476_v53, %v2476_v53  ;;  %v3732_v53 = vld [vmem:[%s4195_s14] sm:$0xff]  }
 0xefe   : > { %v3586_v24 = vpop.f32.mrf.mxu1 }
 0xeff   : > { %3591 = vmatmul.mubr.msk.bf16.vlgmr.msra.gmra.mxu0 %vm1426_vm3, %v2483_v13  ;;  %v3733_v13 = vld [vmem:[%s4209_s26 + $0x18] sm:$0xff]  }
 0xf00   : > { %3601 = vmatpush3.bf16.msra.mxu0 %v2597_v4  ;;  %v2479_v50 = vpop.f32.mrf.mxu1  ;;  %3602 = vmatprep.mubr.msk.bf16.mxu0 %vm3962_vm2, %v3961_v20 }
 0xf01   : > { %3612 = vmatprep.subr.bf16.mxu0 %v3961_v20 }
 0xf02   : > { %v3587_v9 = vpop.f32.mrf.mxu1 }
 0xf04   : > { %v2573_v25 = vpop.f32.mrf.mxu1 }
 0xf05   : > { %v2579_v12 = vmul.f32 0.35355338, %v2573_v25 }
 0xf06   : > { %v3598_v7 = vpop.f32.mrf.mxu1 }
 0xf07   : > { %v2580_v59 = vsel %vm1426_vm3, %v2579_v12, -inf }
 0xf08   : > { %2581 = vmax.xlane.f32.xlu0 %v2580_v59  ;;  %v2576_v27 = vpop.f32.mrf.mxu1 }
 0xf09   : > { %v3255_v27 = vld [vmem:[%s4856_s25] ss:$0 sm:$0xff] }
 0xf0a   : > { %v3599_v29 = vpop.f32.mrf.mxu1 }
 0xf91   : > { %v2582_v30 = vpop.xlane.xlu0 %2581 }
 0xf92   : > { %v2583_v48 = vsub.f32 %v2579_v12, %v2582_v30 }
 0xf94   : > { %v2584_v36 = vmul.f32 1.442695, %v2583_v48 }
 0xf96   : > { %3769 = vpow2.f32 %v2584_v36  ;;  %v3256_v36 = vld [vmem:[%s728_s3] ss:$0 sm:$0xff] }
 0xfa3   : > { %v3770_v55 = vpop.eup %3769 }
 0xfa4   : > { %v2586_v23 = vsel %vm1426_vm3, %v3770_v55, 0.0 }
 0xfa5   : > { %2587 = vadd.xlane.f32.xlu0 %v2586_v23 }
 0xfa9   : > { %2703 = vadd.xlane.f32.xlu0 %v2702_v37 }
 0xfbf   : > { %v2524_v45 = vpop.f32.mrf.mxu0 }
 0xfc0   : > { %v2530_v34 = vadd.f32 %v2524_v45, %v4631_v57 }
 0xfc1   : > { %v3592_v39 = vpop.f32.mrf.mxu0 }
 0xfc2   : > { %v3735_v39 = vld [vmem:[%s4209_s26 + $0x8] sm:$0xff]  }
 0xfc3   : > { %v2527_v43 = vpop.f32.mrf.mxu0 }
 0xfc5   : > { %v3593_v44 = vpop.f32.mrf.mxu0 }
0x102e   : > { %v2588_v46 = vpop.xlane.xlu0 %2587 }
0x102f   : > { %3771 = vrcp.f32 %v2588_v46 }
0x1032   : > { %v2704_v11 = vpop.xlane.xlu0 %2703 }
0x1033   : > { %v2708_v54 = vmul.f32 0.03125, %v2704_v11 }
0x1035   : > { %v2710_v16 = vsub.f32 %v4663_v35, %v2708_v54 }
0x1037   : > { %v2712_v62 = vmul.f32 %v2710_v16, %v2710_v16 }
0x1039   : > { %v2714_v28 = vsel %vm762_vm1, %v2712_v62, 0.0 }
0x103c   : > { %v3772_v49 = vpop.eup %3771 }
0x103d   : > { %v4671_v58 = vmul.f32 %v3772_v49, %v3770_v55 }
0x103f   : > { %v2591_v60 = vpack.c.bf16 %v4671_v58, %v4671_v58 }
0x1041   : > { %3603 = vmatmul.mubr.msk.bf16.vlgmr.msra.gmra.mxu0 %vm1426_vm3, %v2591_v60 }
0x1042   : > { %3616 = vmatprep.mubr.msk.bf16.mxu0 %vm3962_vm2, %v3961_v20  ;;  %3613 = vmatpush3.bf16.msra.mxu0 %v3731_v47 }
0x1043   : > { %3614 = vmatprep.subr.bf16.mxu0 %v3961_v20 }
0x1046   : > { %3615 = vmatpush3.bf16.msra.mxu0 %v3732_v53 }
0x1101   : > { %v2633_v57 = vpop.f32.mrf.mxu0 }
0x1102   : > { %v2640_v32 = vpack.c.bf16 %v2633_v57, %v2633_v57 }
0x1103   : > { %v3604_v15 = vpop.f32.mrf.mxu0 }
0x1104   : > { %3609 = vmatmul.mubr.msk.bf16.vlgmr.msra.gmra.mxu1 %vm1426_vm3, %v2640_v32 }
0x1105   : > { %v2636_v61 = vpop.f32.mrf.mxu0  ;;  %3628 = vmatprep.mubr.msk.bf16.mxu1 %vm3962_vm2, %v3961_v20  ;;  %3621 = vmatpush3.bf16.msra.mxu1 %v3733_v13 }
0x1106   : > { %3622 = vmatprep.subr.bf16.mxu1 %v3961_v20 }
0x1107   : > { %v3605_v56 = vpop.f32.mrf.mxu0 }
0x1108   : > { %v3266_v56 = vld [vmem:[%s744_s22] ss:$0 sm:$0xff] }
0x11c4   : > { %v2681_v0 = vpop.f32.mrf.mxu1 }
0x11c5   : > { %v2687_v2 = vadd.f32 %v2681_v0, %v2530_v34  ;;  %v3734_v34 = vld [vmem:[%s4209_s26 + $0x10] sm:$0xff]  }
0x11c6   : > { %v3610_v5 = vpop.f32.mrf.mxu1  ;;  %3623 = vmatpush3.bf16.msra.mxu1 %v3734_v34 }
0x11c7   : > { %v2688_v38 = vadd.f32 %v3778_v31, %v2687_v2  ;;  %3624 = vmatprep.subr.bf16.mxu1 %v3961_v20 }
0x11c8   : > { %v2684_v51 = vpop.f32.mrf.mxu1 }
0x11c9   : > { %v2696_v63 = vadd.f32 %v4584_v1, %v2688_v38 }
0x11ca   : > { %v3611_v14 = vpop.f32.mrf.mxu1  ;;  %3625 = vmatpush3.bf16.msra.mxu1 %v3735_v39 }
0x11cb   : > { %2697 = vst.msk [vmem:[#allocation2 + $0x8] sm:$0xff] %vm762_vm1, %v2696_v63  ;;  %3626 = vmatprep.subr.bf16.mxu1 %v3961_v20 }
0x11ce   : > { %3627 = vmatpush3.bf16.msra.mxu1 %v3736_v41 }
0x11d2   : > { %v4684_v52 = vld [vmem:[#allocation2 + $0x8] sm:$0xff] }
0x11d3   : > { %v2705_v8 = vsel %vm762_vm1, %v4684_v52, 0.0 }
0x11d4   : > { %2706 = vadd.xlane.f32.xlu0 %v2705_v8 }
0x11d8   : > { %2715 = vadd.xlane.f32.xlu0 %v2714_v28 }
0x125d   : > { %v2707_v1 = vpop.xlane.xlu0 %2706 }
0x125e   : > { %v2709_v18 = vmul.f32 0.03125, %v2707_v1 }
0x1260   : > { %v2711_v19 = vsub.f32 %v4684_v52, %v2709_v18 }
0x1261   : > { %v2716_v24 = vpop.xlane.xlu0 %2715 }
0x1262   : > { %v2713_v40 = vmul.f32 %v2711_v19, %v2711_v19  ;;  %v2720_v4 = vmul.f32 0.03125, %v2716_v24 }
0x1264   : > { %v2717_v6 = vsel %vm762_vm1, %v2713_v40, 0.0  ;;  %v2722_v50 = vadd.f32 1e-05, %v2720_v4 }
0x1265   : > { %2718 = vadd.xlane.f32.xlu1 %v2717_v6 }
0x1266   : > { %3773 = vrsqrt.f32 %v2722_v50 }
0x1273   : > { %v3774_v7 = vpop.eup %3773 }
0x1274   : > { %v2726_v59 = vmul.f32 %v3774_v7, %v2710_v16 }
0x1276   : > { %v2734_v48 = vmul.f32 %v3255_v27, %v2726_v59 }
0x1278   : > { %v2742_v23 = vadd.f32 %v3256_v36, %v2734_v48 }
0x12ee   : > { %v2719_v9 = vpop.xlane.xlu1 %2718 }
0x12ef   : > { %v2721_v25 = vmul.f32 0.03125, %v2719_v9 }
0x12f1   : > { %v2723_v12 = vadd.f32 1e-05, %v2721_v25 }
0x12f3   : > { %3775 = vrsqrt.f32 %v2723_v12 }
0x1300   : > { %v3776_v29 = vpop.eup %3775 }
0x1301   : > { %v2727_v30 = vmul.f32 %v3776_v29, %v2711_v19 }
0x1303   : > { %v2735_v55 = vmul.f32 %v3255_v27, %v2727_v30 }
0x1305   : > { %v2743_v37 = vadd.f32 %v3256_v36, %v2735_v55 }
0x1307   : > { %v2748_v45 = vpack.c.bf16 %v2743_v37, %v2742_v23 }
0x1309   : > { %3617 = vmatmul.mubr.msk.bf16.vlgmr.msra.gmra.mxu0 %vm762_vm1, %v2748_v45 }
0x13c9   : > { %v2805_v43 = vpop.f32.mrf.mxu0 }
0x13ca   : > { %v2806_v46 = vadd.f32 %v3257_v42, %v2805_v43 }
0x13cb   : > { %v3618_v44 = vpop.f32.mrf.mxu0 }
0x13cc   : > { %v2812_v32 = vmax.f32 %v2806_v46, 0.0 }
0x13cd   : > { %v2808_v49 = vpop.f32.mrf.mxu0 }
0x13ce   : > { %v2809_v60 = vadd.f32 %v3257_v42, %v2808_v49 }
0x13cf   : > { %v3619_v57 = vpop.f32.mrf.mxu0 }
0x13d0   : > { %v2813_v15 = vmax.f32 %v2809_v60, 0.0 }
0x13d2   : > { %v2822_v61 = vpack.c.bf16 %v2813_v15, %v2812_v32 }
0x13d4   : > { %3629 = vmatmul.mubr.msk.bf16.vlgmr.msra.gmra.mxu1 %vm2847_vm5, %v2822_v61 }
0x1494   : > { %v2885_v20 = vpop.f32.mrf.mxu1 }
0x1495   : > { %v2892_v0 = vadd.f32 %v2885_v20, %v4663_v35 }
0x1496   : > { %v3630_v2 = vpop.f32.mrf.mxu1 }
0x1497   : > { %v2901_v5 = vadd.f32 %v3266_v56, %v2892_v0 }
0x1498   : > { %v2888_v31 = vpop.f32.mrf.mxu1 }
0x1499   : > { %2903 = vst.msk [vmem:[#allocation2] sm:$0xff] %vm762_vm1, %v2901_v5  ;;  %v2893_v38 = vadd.f32 %v2888_v31, %v4684_v52  ;;  %2908 = sbr.rel (%p3267_p4) target bundleno = 5591 (0x15d7), region = 96 }
0x149a   : > { %v3631_v11 = vpop.f32.mrf.mxu1 }
0x149b   : > { %v2902_v51 = vadd.f32 %v3266_v56, %v2893_v38 }
0x149d   : > { %2904 = vst.msk [vmem:[#allocation2 + $0x8] sm:$0xff] %vm762_vm1, %v2902_v51 }
0x149e   : > { %v2911_v63 = vsel %vm762_vm1, %v2901_v5, 0.0  ;;  %2956 = vst.msk [vmem:[#allocation9] sm:$0xff] %vm1426_vm3, %v4436_v26  ;;  %2958 = vst.msk [vmem:[#allocation9 + $0x8] sm:$0xff] %vm1426_vm3, %v4445_v33  ;;  %v2914_v26 = vsel %vm762_vm1, %v2902_v51, 0.0  ;;  %v3268_v19 = vld [vmem:[%s4859_s24] ss:$0 sm:$0xff] }
0x149f   : > { %2960 = vst.msk [vmem:[#allocation9 + $0x10] sm:$0xff] %vm1426_vm3, %v4504_v3  ;;  %2962 = vst.msk [vmem:[#allocation9 + $0x18] sm:$0xff] %vm1426_vm3, %v4544_v10  ;;  %2912 = vadd.xlane.f32.xlu0 %v2911_v63  ;;  %v3269_v6 = vld [vmem:[%s4860_s11] ss:$0 sm:$0xff] }
0x14a0   : > { %2964 = vst.msk [vmem:[#allocation9 + $0x20] sm:$0xff] %vm1426_vm3, %v4590_v21  ;;  %2966 = vst.msk [vmem:[#allocation9 + $0x28] sm:$0xff] %vm1426_vm3, %v4600_v22 }
0x14a1   : > { %2968 = vst.msk [vmem:[#allocation9 + $0x30] sm:$0xff] %vm1426_vm3, %v4640_v17  ;;  %2970 = vst.msk [vmem:[#allocation9 + $0x38] sm:$0xff] %vm1426_vm3, %v4671_v58 }
0x14a3   : > { %2915 = vadd.xlane.f32.xlu0 %v2914_v26 }
0x1528   : > { %v2913_v33 = vpop.xlane.xlu0 %2912 }
0x1529   : > { %v2917_v3 = vmul.f32 0.03125, %v2913_v33 }
0x152b   : > { %v2919_v35 = vsub.f32 %v2901_v5, %v2917_v3 }
0x152c   : > { %v2916_v10 = vpop.xlane.xlu0 %2915 }
0x152d   : > { %v2918_v14 = vmul.f32 0.03125, %v2916_v10  ;;  %v2921_v54 = vmul.f32 %v2919_v35, %v2919_v35 }
0x152f   : > { %v2920_v21 = vsub.f32 %v2902_v51, %v2918_v14  ;;  %v2923_v16 = vsel %vm762_vm1, %v2921_v54, 0.0 }
0x1530   : > { %2924 = vadd.xlane.f32.xlu1 %v2923_v16 }
0x1531   : > { %v2922_v22 = vmul.f32 %v2920_v21, %v2920_v21 }
0x1533   : > { %v2926_v17 = vsel %vm762_vm1, %v2922_v22, 0.0 }
0x1534   : > { %2927 = vadd.xlane.f32.xlu1 %v2926_v17 }
0x15b9   : > { %v2925_v52 = vpop.xlane.xlu1 %2924 }
0x15ba   : > { %v2929_v58 = vmul.f32 0.03125, %v2925_v52 }
0x15bc   : > { %v2931_v8 = vadd.f32 1e-05, %v2929_v58 }
0x15bd   : > { %v2928_v62 = vpop.xlane.xlu1 %2927 }
0x15be   : > { %3779 = vrsqrt.f32 %v2931_v8  ;;  %v2930_v28 = vmul.f32 0.03125, %v2928_v62 }
0x15c0   : > { %v2932_v1 = vadd.f32 1e-05, %v2930_v28 }
0x15c2   : > { %3781 = vrsqrt.f32 %v2932_v1 }
0x15cb   : > { %v3780_v18 = vpop.eup %3779 }
0x15cc   : > { %v2935_v40 = vmul.f32 %v3780_v18, %v2919_v35 }
0x15ce   : > { %v2943_v47 = vmul.f32 %v3268_v19, %v2935_v40 }
0x15cf   : > { %v3782_v53 = vpop.eup %3781 }
0x15d0   : > { %v2951_v13 = vadd.f32 %v3269_v6, %v2943_v47  ;;  %v2936_v24 = vmul.f32 %v3782_v53, %v2920_v21 }
0x15d2   : > { %2953 = vst.msk [vmem:[#allocation8] sm:$0xff] %vm762_vm1, %v2951_v13  ;;  %v2944_v4 = vmul.f32 %v3268_v19, %v2936_v24 }
0x15d4   : > { %v2952_v50 = vadd.f32 %v3269_v6, %v2944_v4 }
0x15d6   : > { %2955 = vst.msk [vmem:[#allocation8 + $0x8] sm:$0xff] %vm762_vm1, %v2952_v50 }
0x15d7 PF: > { %s4861_s16 = sld [smem:[#allocation18_spill]]  ;;  %s3966_s19 = smov [#allocation8]  }
0x15d8   : > { %s2980_s15 = sshll.u32 %s3966_s19, 4  ;;  %s2981_s15 = int_to_ptr.vmem [resolvable:$true] %s2980_s15 }
0x15d9   : > { %s3837_s1 = scalar_lea.vmem %s2981_s15, 256  ;;  %p3844_p13 = scmp.lt.s32.totalorder %s2981_s15, %s2981_s15 }
0x15da   : > { %p3838_p10 = scmp.ne.s32.totalorder %s2981_s15, %s3837_s1  ;;  %p3845_p0 = scmp.lt.s32.totalorder %s3837_s1, %s3837_s1 }
0x15dc   : > { %p3846_p2 = por %p3845_p0, %p3844_p13 }
0x15dd   : > { %s4862_s28 = sadd.s32 4294967295, %s4861_s16  }
0x15de   : > { %p4757_p9 = scmp.eq.s32.totalorder %s4862_s28, 1 }
0x15e0   : > { %p3839_p7 = pnand %p3838_p10, %p4757_p9 }
0x15e2   : > { %p3840_p12 = pneg %p3839_p7 }
0x15e4   : > { %p3847_p3 = pnand %p3846_p2, %p3840_p12 }
0x15e6   : > { %3850 = shalt.err (!%p3847_p3)
}
0x15e7   : > { %s3967_s12 = smov 128   ;;  %s3968_s23 = smov 8  }
0x15e8   : > { %s4864_s25 = sld [smem:[#allocation30_spill]]  ;;  %s3969_s29 = smov [#allocation9]  }
0x15e9   : > { %s2997_s20 = sshll.u32 %s3969_s29, 4  ;;  %s2998_s20 = int_to_ptr.vmem [resolvable:$true] %s2997_s20 }
0x15ea   : > { %s3861_s27 = scalar_lea.vmem %s2998_s20, 1024  ;;  %p3868_p5 = scmp.lt.s32.totalorder %s2998_s20, %s2998_s20 }
0x15eb   : > { %p3862_p6 = scmp.ne.s32.totalorder %s2998_s20, %s3861_s27  ;;  %p3869_p1 = scmp.lt.s32.totalorder %s3861_s27, %s3861_s27 }
0x15ed   : > { %p3863_p8 = pnand %p3862_p6, %p4757_p9  ;;  %p3870_p4 = por %p3869_p1, %p3868_p5 }
0x15ee   : > { %3639 = dma.vmem_to_hbm [thread:$0]  (%p4757_p9), %s2981_s15, 256, %s4864_s25, [#allocation5], %s3967_s12, %s3967_s12, %s3968_s23  }
0x15ef   : > { %p3864_p11 = pneg %p3863_p8 }
0x15f1   : > { %p3871_p10 = pnand %p3870_p4, %p3864_p11 }
0x15f3   : > { %3874 = shalt.err (!%p3871_p10)
}
0x15f4   : > { %s4865_s0 = sld [smem:[#allocation31_spill]] }
0x15fa   : > { %3641 = dma.vmem_to_hbm [thread:$0]  (%p4757_p9), %s2998_s20, 1024, %s4865_s0, [#allocation10], %s3967_s12, %s3967_s12, %s3968_s23  }
0x15fb   : > { %3918 = dma.done.wait (%p4757_p9), [#allocation5], 256  }
0x15fc   : > { %3920 = vsyncadd (%p4757_p9), [#allocation5], 4294967040 }
0x15fd   : > { %3922 = dma.done.wait (%p4757_p9), [#allocation10], 1024  }
0x15fe   : > { %3924 = vsyncadd (%p4757_p9), [#allocation10], 4294966272 }
0x15ff PF: > { %s4866_s26 = sld [smem:[#allocation18_spill]] }
0x1600   : > { %s4867_s21 = sld [smem:[#allocation15_spill]] }
0x1601   : > { %s4868_s22 = sld [smem:[#allocation16_spill]] }
0x1602   : > { %s4869_s23 = sld [smem:[#allocation20_spill]] }
0x1603   : > { %s4870_s24 = sld [smem:[#allocation17_spill]] }
0x1604   : > { %s4871_s25 = sld [smem:[#allocation19_spill]] }
0x1605   : > { %s33_s26 = sadd.s32 1, %s4866_s26  }
0x1606   : > { %p30_p7 = scmp.ge.s32.totalorder %s33_s26, 4  }
0x1608   :  { %32 = sbr.rel (!%p30_p7) target bundleno = 19 (0x13), region = 183 }
0x160d   :  { %3017 = vsyncpa [#allocation4], 1 }
0x160e   :  { %3019 = vsyncpa [#allocation4 + $0x1], 1 }
0x160f   :  { %3020 = vsyncpa [#allocation7], 1 }
0x1610   :  { %3022 = vsyncpa [#allocation7 + $0x1], 1 }
0x1611   :  { %3023 = vsyncpa [#allocation5], 1 }
0x1612   :  { %3025 = vsyncpa [#allocation5 + $0x1], 1 }
0x1613   :  { %3026 = vsyncpa [#allocation10], 1 }

</bundles_post_ra>
